<compile_context>
chip_gen: v7x
topology: tpu7x:2x2x1
jax: 0.10.0
libtpu: 0.0.40
codegen_flags: <defaults>
</compile_context>

<pallas_src>
import functools

import jax
import jax.numpy as jnp
from jax.experimental import pallas as pl
from jax.experimental.pallas import tpu as pltpu

BN_EPS = 1e-5
F_PAD = 128  # lane-dense padded feature width


def _sage_fused_kernel(adj_ref, deg_inv_ref, x_ref, w_ref, bl_ref,
                       gamma_ref, beta_ref, rand_ref, o_ref, *,
                       num_layers, out_c, dropout_p, training):
    adj = adj_ref[...]            # (N, N) bf16 -- loaded once, reused by every layer
    deg_inv = deg_inv_ref[...]    # (N, 1) f32
    h = x_ref[...]                # (N, F_PAD) f32 (zero-padded features)

    for i in range(num_layers):
        # --- SAGEConv (reordered, fused projections) --------------------------------
        #   out = lin_l(mean_j x_j) + lin_r(x_i)
        #       = D^-1 A (X Wl) + bl + X Wr        (deg_inv = per-row diagonal of D^-1)
        # Wl|Wr are concatenated -> single (N,128)@(128,256) MXU dot; the split at
        # column 128 lands on a (8,128) tile boundary (no copy).
        proj = jnp.dot(h, w_ref[i], preferred_element_type=jnp.float32)  # (N, 2*F_PAD)
        xw = proj[:, :F_PAD]
        xr = proj[:, F_PAD:]
        agg = jnp.dot(adj, xw.astype(jnp.bfloat16),          # bf16 MXU path, f32 acc
                      preferred_element_type=jnp.float32)
        h = agg * deg_inv + bl_ref[i] + xr

        if i < num_layers - 1:
            # --- BatchNorm1d (training mode: batch mean / biased batch var) ----------
            mean = jnp.mean(h, axis=0, keepdims=True)
            var = jnp.mean((h - mean) ** 2, axis=0, keepdims=True)
            h = (h - mean) * jax.lax.rsqrt(var + BN_EPS)
            h = h * gamma_ref[i] + beta_ref[i]
            # --- ReLU -----------------------------------------------------------------
            h = jnp.maximum(h, 0.0)
            # --- Dropout (inverted; uniforms supplied by the wrapper) ------------------
            if training and dropout_p > 0.0:
                inv_keep = 1.0 / (1.0 - dropout_p)
                h = jnp.where(rand_ref[i] >= dropout_p, h * inv_keep, 0.0)
        else:
            # --- final layer: lane-dense masked log_softmax ----------------------------
            col = jax.lax.broadcasted_iota(jnp.int32, h.shape, 1)
            h = jnp.where(col < out_c, h, -1e30)             # neutralize padded classes
            m = jnp.max(h, axis=-1, keepdims=True)
            lse = jnp.log(jnp.sum(jnp.exp(h - m), axis=-1, keepdims=True))
            h = h - m - lse

    o_ref[...] = h


def _pad2(a, rows, cols):
    return jnp.pad(a, ((0, rows - a.shape[0]), (0, cols - a.shape[1])))


def init_sage_params(key, in_channels, hidden_channels, out_channels, num_layers):
    """Deterministic parameter init mirroring the module's __init__ shapes."""
    dims = [in_channels] + [hidden_channels] * (num_layers - 1) + [out_channels]
    params = []
    for i in range(num_layers):
        fin, fout = dims[i], dims[i + 1]
        key, k1, k2 = jax.random.split(key, 3)
        scale = 1.0 / jnp.sqrt(jnp.float32(fin))
        wl = jax.random.uniform(k1, (fin, fout), jnp.float32, -scale, scale)
        wr = jax.random.uniform(k2, (fin, fout), jnp.float32, -scale, scale)
        layer = {"wl": wl, "wr": wr, "bl": jnp.zeros((fout,), jnp.float32)}
        if i < num_layers - 1:
            layer["gamma"] = jnp.ones((fout,), jnp.float32)   # BN default init
            layer["beta"] = jnp.zeros((fout,), jnp.float32)
        params.append(layer)
    return params


def sage_forward(x, adj, params, dropout_p, *, training=True, rng_key=None):
    n, _ = x.shape
    num_layers = len(params)
    out_c = int(params[-1]["wl"].shape[1])

    # mean-aggregation normalization; adjacency streamed to the kernel as bf16
    deg = jnp.sum(adj, axis=1, keepdims=True)
    deg_inv = jnp.where(deg > 0, 1.0 / jnp.maximum(deg, 1.0), 0.0).astype(jnp.float32)
    adj_bf16 = adj.astype(jnp.bfloat16)

    # zero-pad features / params to lane-dense width; fuse Wl|Wr per layer
    x_p = _pad2(x, n, F_PAD)
    w = jnp.stack([
        jnp.concatenate([_pad2(p["wl"], F_PAD, F_PAD),
                         _pad2(p["wr"], F_PAD, F_PAD)], axis=1)
        for p in params])                                   # (L, F_PAD, 2*F_PAD)
    bl = jnp.stack([_pad2(p["bl"][None, :], 1, F_PAD) for p in params])

    if num_layers > 1:
        gamma = jnp.stack([_pad2(p["gamma"][None, :], 1, F_PAD) for p in params[:-1]])
        beta = jnp.stack([_pad2(p["beta"][None, :], 1, F_PAD) for p in params[:-1]])
    else:
        gamma = jnp.zeros((1, 1, F_PAD), jnp.float32)
        beta = jnp.zeros((1, 1, F_PAD), jnp.float32)

    if rng_key is None:
        rng_key = jax.random.PRNGKey(0)
    n_drop = max(num_layers - 1, 1)
    rand = jax.random.uniform(rng_key, (n_drop, n, F_PAD), jnp.float32)

    kernel = functools.partial(
        _sage_fused_kernel, num_layers=num_layers, out_c=out_c,
        dropout_p=float(dropout_p), training=bool(training))

    vmem = pl.BlockSpec(memory_space=pltpu.MemorySpace.VMEM)
    out = pl.pallas_call(
        kernel,
        out_shape=jax.ShapeDtypeStruct((n, F_PAD), jnp.float32),
        in_specs=[vmem] * 8,
        out_specs=vmem,
        compiler_params=pltpu.CompilerParams(vmem_limit_bytes=64 * 1024 * 1024),
    )(adj_bf16, deg_inv, x_p, w, bl, gamma, beta, rand)

    return out[:, :out_c]


if __name__ == "__main__":
    # Deterministic small problem: 128-node graph, features 16 -> 32 -> 32 -> 8.
    N, IN_C, HID_C, OUT_C = 128, 16, 32, 8
    NUM_LAYERS, DROPOUT = 3, 0.5

    key = jax.random.PRNGKey(0)
    key, kx, kadj, kp, kdrop = jax.random.split(key, 5)

    x = jax.random.normal(kx, (N, IN_C), dtype=jnp.float32)
    # sparse-ish random adjacency (~20% density), dense representation
    adj = (jax.random.uniform(kadj, (N, N)) < 0.2).astype(jnp.float32)

    params = init_sage_params(kp, IN_C, HID_C, OUT_C, NUM_LAYERS)

    out = sage_forward(x, adj, params, DROPOUT, training=True, rng_key=kdrop)
    out = jax.block_until_ready(out)

    assert out.shape == (N, OUT_C)
    # log_softmax rows must (log-)normalize to ~0
    row_logsumexp = jax.scipy.special.logsumexp(out, axis=-1)
    assert jnp.max(jnp.abs(row_logsumexp)) < 1e-3

    print("KERNEL_OK")
</pallas_src>

<mosaic_0001>
module attributes {stable_mosaic.version = 11 : i64} {
  func.func @_sage_fused_kernel(%arg0: memref<128x128xbf16, #tpu.memory_space<vmem>>, %arg1: memref<128x1xf32, #tpu.memory_space<vmem>>, %arg2: memref<128x128xf32, #tpu.memory_space<vmem>>, %arg3: memref<3x128x256xf32, #tpu.memory_space<vmem>>, %arg4: memref<3x1x128xf32, #tpu.memory_space<vmem>>, %arg5: memref<2x1x128xf32, #tpu.memory_space<vmem>>, %arg6: memref<2x1x128xf32, #tpu.memory_space<vmem>>, %arg7: memref<2x128x128xf32, #tpu.memory_space<vmem>>, %arg8: memref<128x128xf32, #tpu.memory_space<vmem>>) attributes {dimension_semantics = [], scalar_prefetch = 0 : i64, scratch_operands = 0 : i64, tpu.core_type = #tpu.core_type<tc>} {
    %c0 = arith.constant 0 : index
    %c0_0 = arith.constant 0 : index
    %0 = vector.load %arg0[%c0, %c0_0] : memref<128x128xbf16, #tpu.memory_space<vmem>>, vector<128x128xbf16>
    %c0_1 = arith.constant 0 : index
    %c0_2 = arith.constant 0 : index
    %1 = vector.load %arg1[%c0_1, %c0_2] : memref<128x1xf32, #tpu.memory_space<vmem>>, vector<128x1xf32>
    %c0_3 = arith.constant 0 : index
    %c0_4 = arith.constant 0 : index
    %2 = vector.load %arg2[%c0_3, %c0_4] : memref<128x128xf32, #tpu.memory_space<vmem>>, vector<128x128xf32>
    %c0_5 = arith.constant 0 : index
    %c0_6 = arith.constant 0 : index
    %c0_7 = arith.constant 0 : index
    %3 = vector.load %arg3[%c0_5, %c0_6, %c0_7] : memref<3x128x256xf32, #tpu.memory_space<vmem>>, vector<1x128x256xf32>
    %4 = vector.shape_cast %3 : vector<1x128x256xf32> to vector<128x256xf32>
    %cst = arith.constant dense<0.000000e+00> : vector<128x256xf32>
    %5 = tpu.matmul %2, %4, %cst {dimension_numbers = #tpu.dot_dimension_numbers<[1], [0], [0], [1], [0, 0, 1, 1], [], []>} : vector<128x128xf32>, vector<128x256xf32>, vector<128x256xf32> -> vector<128x256xf32>
    %6 = vector.extract_strided_slice %5 {offsets = [0, 0], sizes = [128, 128], strides = [1, 1]} : vector<128x256xf32> to vector<128x128xf32>
    %7 = vector.extract_strided_slice %5 {offsets = [0, 128], sizes = [128, 128], strides = [1, 1]} : vector<128x256xf32> to vector<128x128xf32>
    %8 = arith.truncf %6 : vector<128x128xf32> to vector<128x128xbf16>
    %cst_8 = arith.constant dense<0.000000e+00> : vector<128x128xf32>
    %9 = tpu.matmul %0, %8, %cst_8 {dimension_numbers = #tpu.dot_dimension_numbers<[1], [0], [0], [1], [0, 0, 1, 1], [], []>} : vector<128x128xbf16>, vector<128x128xbf16>, vector<128x128xf32> -> vector<128x128xf32>
    %10 = vector.broadcast %1 : vector<128x1xf32> to vector<128x128xf32>
    %11 = arith.mulf %9, %10 : vector<128x128xf32>
    %c0_9 = arith.constant 0 : index
    %c0_10 = arith.constant 0 : index
    %c0_11 = arith.constant 0 : index
    %12 = vector.load %arg4[%c0_9, %c0_10, %c0_11] : memref<3x1x128xf32, #tpu.memory_space<vmem>>, vector<1x1x128xf32>
    %13 = vector.shape_cast %12 : vector<1x1x128xf32> to vector<1x128xf32>
    %14 = vector.broadcast %13 : vector<1x128xf32> to vector<128x128xf32>
    %15 = arith.addf %11, %14 : vector<128x128xf32>
    %16 = arith.addf %15, %7 : vector<128x128xf32>
    %cst_12 = arith.constant dense<0.000000e+00> : vector<128xf32>
    %17 = vector.multi_reduction <add>, %16, %cst_12 [0] : vector<128x128xf32> to vector<128xf32>
    %18 = vector.shape_cast %17 : vector<128xf32> to vector<1x128xf32>
    %cst_13 = arith.constant 1.280000e+02 : f32
    %19 = vector.broadcast %cst_13 : f32 to vector<1x128xf32>
    %20 = arith.divf %18, %19 : vector<1x128xf32>
    %21 = vector.broadcast %20 : vector<1x128xf32> to vector<128x128xf32>
    %22 = arith.subf %16, %21 : vector<128x128xf32>
    %23 = arith.mulf %22, %22 : vector<128x128xf32>
    %cst_14 = arith.constant dense<0.000000e+00> : vector<128xf32>
    %24 = vector.multi_reduction <add>, %23, %cst_14 [0] : vector<128x128xf32> to vector<128xf32>
    %25 = vector.shape_cast %24 : vector<128xf32> to vector<1x128xf32>
    %cst_15 = arith.constant 1.280000e+02 : f32
    %26 = vector.broadcast %cst_15 : f32 to vector<1x128xf32>
    %27 = arith.divf %25, %26 : vector<1x128xf32>
    %28 = vector.broadcast %20 : vector<1x128xf32> to vector<128x128xf32>
    %29 = arith.subf %16, %28 : vector<128x128xf32>
    %cst_16 = arith.constant 9.99999974E-6 : f32
    %30 = vector.broadcast %cst_16 : f32 to vector<1x128xf32>
    %31 = arith.addf %27, %30 : vector<1x128xf32>
    %32 = math.rsqrt %31 : vector<1x128xf32>
    %33 = vector.broadcast %32 : vector<1x128xf32> to vector<128x128xf32>
    %34 = arith.mulf %29, %33 : vector<128x128xf32>
    %c0_17 = arith.constant 0 : index
    %c0_18 = arith.constant 0 : index
    %c0_19 = arith.constant 0 : index
    %35 = vector.load %arg5[%c0_17, %c0_18, %c0_19] : memref<2x1x128xf32, #tpu.memory_space<vmem>>, vector<1x1x128xf32>
    %36 = vector.shape_cast %35 : vector<1x1x128xf32> to vector<1x128xf32>
    %37 = vector.broadcast %36 : vector<1x128xf32> to vector<128x128xf32>
    %38 = arith.mulf %34, %37 : vector<128x128xf32>
    %c0_20 = arith.constant 0 : index
    %c0_21 = arith.constant 0 : index
    %c0_22 = arith.constant 0 : index
    %39 = vector.load %arg6[%c0_20, %c0_21, %c0_22] : memref<2x1x128xf32, #tpu.memory_space<vmem>>, vector<1x1x128xf32>
    %40 = vector.shape_cast %39 : vector<1x1x128xf32> to vector<1x128xf32>
    %41 = vector.broadcast %40 : vector<1x128xf32> to vector<128x128xf32>
    %42 = arith.addf %38, %41 : vector<128x128xf32>
    %cst_23 = arith.constant 0.000000e+00 : f32
    %43 = vector.broadcast %cst_23 : f32 to vector<128x128xf32>
    %44 = arith.maximumf %42, %43 : vector<128x128xf32>
    %c0_24 = arith.constant 0 : index
    %c0_25 = arith.constant 0 : index
    %c0_26 = arith.constant 0 : index
    %45 = vector.load %arg7[%c0_24, %c0_25, %c0_26] : memref<2x128x128xf32, #tpu.memory_space<vmem>>, vector<1x128x128xf32>
    %46 = vector.shape_cast %45 : vector<1x128x128xf32> to vector<128x128xf32>
    %cst_27 = arith.constant 5.000000e-01 : f32
    %47 = vector.broadcast %cst_27 : f32 to vector<128x128xf32>
    %48 = arith.cmpf oge, %46, %47 : vector<128x128xf32>
    %cst_28 = arith.constant 2.000000e+00 : f32
    %49 = vector.broadcast %cst_28 : f32 to vector<128x128xf32>
    %50 = arith.mulf %44, %49 : vector<128x128xf32>
    %cst_29 = arith.constant 0.000000e+00 : f32
    %51 = vector.broadcast %cst_29 : f32 to vector<128x128xf32>
    %52 = arith.select %48, %50, %51 : vector<128x128xi1>, vector<128x128xf32>
    %c1 = arith.constant 1 : index
    %c0_30 = arith.constant 0 : index
    %c0_31 = arith.constant 0 : index
    %53 = vector.load %arg3[%c1, %c0_30, %c0_31] : memref<3x128x256xf32, #tpu.memory_space<vmem>>, vector<1x128x256xf32>
    %54 = vector.shape_cast %53 : vector<1x128x256xf32> to vector<128x256xf32>
    %cst_32 = arith.constant dense<0.000000e+00> : vector<128x256xf32>
    %55 = tpu.matmul %52, %54, %cst_32 {dimension_numbers = #tpu.dot_dimension_numbers<[1], [0], [0], [1], [0, 0, 1, 1], [], []>} : vector<128x128xf32>, vector<128x256xf32>, vector<128x256xf32> -> vector<128x256xf32>
    %56 = vector.extract_strided_slice %55 {offsets = [0, 0], sizes = [128, 128], strides = [1, 1]} : vector<128x256xf32> to vector<128x128xf32>
    %57 = vector.extract_strided_slice %55 {offsets = [0, 128], sizes = [128, 128], strides = [1, 1]} : vector<128x256xf32> to vector<128x128xf32>
    %58 = arith.truncf %56 : vector<128x128xf32> to vector<128x128xbf16>
    %cst_33 = arith.constant dense<0.000000e+00> : vector<128x128xf32>
    %59 = tpu.matmul %0, %58, %cst_33 {dimension_numbers = #tpu.dot_dimension_numbers<[1], [0], [0], [1], [0, 0, 1, 1], [], []>} : vector<128x128xbf16>, vector<128x128xbf16>, vector<128x128xf32> -> vector<128x128xf32>
    %60 = vector.broadcast %1 : vector<128x1xf32> to vector<128x128xf32>
    %61 = arith.mulf %59, %60 : vector<128x128xf32>
    %c1_34 = arith.constant 1 : index
    %c0_35 = arith.constant 0 : index
    %c0_36 = arith.constant 0 : index
    %62 = vector.load %arg4[%c1_34, %c0_35, %c0_36] : memref<3x1x128xf32, #tpu.memory_space<vmem>>, vector<1x1x128xf32>
    %63 = vector.shape_cast %62 : vector<1x1x128xf32> to vector<1x128xf32>
    %64 = vector.broadcast %63 : vector<1x128xf32> to vector<128x128xf32>
    %65 = arith.addf %61, %64 : vector<128x128xf32>
    %66 = arith.addf %65, %57 : vector<128x128xf32>
    %cst_37 = arith.constant dense<0.000000e+00> : vector<128xf32>
    %67 = vector.multi_reduction <add>, %66, %cst_37 [0] : vector<128x128xf32> to vector<128xf32>
    %68 = vector.shape_cast %67 : vector<128xf32> to vector<1x128xf32>
    %cst_38 = arith.constant 1.280000e+02 : f32
    %69 = vector.broadcast %cst_38 : f32 to vector<1x128xf32>
    %70 = arith.divf %68, %69 : vector<1x128xf32>
    %71 = vector.broadcast %70 : vector<1x128xf32> to vector<128x128xf32>
    %72 = arith.subf %66, %71 : vector<128x128xf32>
    %73 = arith.mulf %72, %72 : vector<128x128xf32>
    %cst_39 = arith.constant dense<0.000000e+00> : vector<128xf32>
    %74 = vector.multi_reduction <add>, %73, %cst_39 [0] : vector<128x128xf32> to vector<128xf32>
    %75 = vector.shape_cast %74 : vector<128xf32> to vector<1x128xf32>
    %cst_40 = arith.constant 1.280000e+02 : f32
    %76 = vector.broadcast %cst_40 : f32 to vector<1x128xf32>
    %77 = arith.divf %75, %76 : vector<1x128xf32>
    %78 = vector.broadcast %70 : vector<1x128xf32> to vector<128x128xf32>
    %79 = arith.subf %66, %78 : vector<128x128xf32>
    %cst_41 = arith.constant 9.99999974E-6 : f32
    %80 = vector.broadcast %cst_41 : f32 to vector<1x128xf32>
    %81 = arith.addf %77, %80 : vector<1x128xf32>
    %82 = math.rsqrt %81 : vector<1x128xf32>
    %83 = vector.broadcast %82 : vector<1x128xf32> to vector<128x128xf32>
    %84 = arith.mulf %79, %83 : vector<128x128xf32>
    %c1_42 = arith.constant 1 : index
    %c0_43 = arith.constant 0 : index
    %c0_44 = arith.constant 0 : index
    %85 = vector.load %arg5[%c1_42, %c0_43, %c0_44] : memref<2x1x128xf32, #tpu.memory_space<vmem>>, vector<1x1x128xf32>
    %86 = vector.shape_cast %85 : vector<1x1x128xf32> to vector<1x128xf32>
    %87 = vector.broadcast %86 : vector<1x128xf32> to vector<128x128xf32>
    %88 = arith.mulf %84, %87 : vector<128x128xf32>
    %c1_45 = arith.constant 1 : index
    %c0_46 = arith.constant 0 : index
    %c0_47 = arith.constant 0 : index
    %89 = vector.load %arg6[%c1_45, %c0_46, %c0_47] : memref<2x1x128xf32, #tpu.memory_space<vmem>>, vector<1x1x128xf32>
    %90 = vector.shape_cast %89 : vector<1x1x128xf32> to vector<1x128xf32>
    %91 = vector.broadcast %90 : vector<1x128xf32> to vector<128x128xf32>
    %92 = arith.addf %88, %91 : vector<128x128xf32>
    %cst_48 = arith.constant 0.000000e+00 : f32
    %93 = vector.broadcast %cst_48 : f32 to vector<128x128xf32>
    %94 = arith.maximumf %92, %93 : vector<128x128xf32>
    %c1_49 = arith.constant 1 : index
    %c0_50 = arith.constant 0 : index
    %c0_51 = arith.constant 0 : index
    %95 = vector.load %arg7[%c1_49, %c0_50, %c0_51] : memref<2x128x128xf32, #tpu.memory_space<vmem>>, vector<1x128x128xf32>
    %96 = vector.shape_cast %95 : vector<1x128x128xf32> to vector<128x128xf32>
    %cst_52 = arith.constant 5.000000e-01 : f32
    %97 = vector.broadcast %cst_52 : f32 to vector<128x128xf32>
    %98 = arith.cmpf oge, %96, %97 : vector<128x128xf32>
    %cst_53 = arith.constant 2.000000e+00 : f32
    %99 = vector.broadcast %cst_53 : f32 to vector<128x128xf32>
    %100 = arith.mulf %94, %99 : vector<128x128xf32>
    %cst_54 = arith.constant 0.000000e+00 : f32
    %101 = vector.broadcast %cst_54 : f32 to vector<128x128xf32>
    %102 = arith.select %98, %100, %101 : vector<128x128xi1>, vector<128x128xf32>
    %c2 = arith.constant 2 : index
    %c0_55 = arith.constant 0 : index
    %c0_56 = arith.constant 0 : index
    %103 = vector.load %arg3[%c2, %c0_55, %c0_56] : memref<3x128x256xf32, #tpu.memory_space<vmem>>, vector<1x128x256xf32>
    %104 = vector.shape_cast %103 : vector<1x128x256xf32> to vector<128x256xf32>
    %cst_57 = arith.constant dense<0.000000e+00> : vector<128x256xf32>
    %105 = tpu.matmul %102, %104, %cst_57 {dimension_numbers = #tpu.dot_dimension_numbers<[1], [0], [0], [1], [0, 0, 1, 1], [], []>} : vector<128x128xf32>, vector<128x256xf32>, vector<128x256xf32> -> vector<128x256xf32>
    %106 = vector.extract_strided_slice %105 {offsets = [0, 0], sizes = [128, 128], strides = [1, 1]} : vector<128x256xf32> to vector<128x128xf32>
    %107 = vector.extract_strided_slice %105 {offsets = [0, 128], sizes = [128, 128], strides = [1, 1]} : vector<128x256xf32> to vector<128x128xf32>
    %108 = arith.truncf %106 : vector<128x128xf32> to vector<128x128xbf16>
    %cst_58 = arith.constant dense<0.000000e+00> : vector<128x128xf32>
    %109 = tpu.matmul %0, %108, %cst_58 {dimension_numbers = #tpu.dot_dimension_numbers<[1], [0], [0], [1], [0, 0, 1, 1], [], []>} : vector<128x128xbf16>, vector<128x128xbf16>, vector<128x128xf32> -> vector<128x128xf32>
    %110 = vector.broadcast %1 : vector<128x1xf32> to vector<128x128xf32>
    %111 = arith.mulf %109, %110 : vector<128x128xf32>
    %c2_59 = arith.constant 2 : index
    %c0_60 = arith.constant 0 : index
    %c0_61 = arith.constant 0 : index
    %112 = vector.load %arg4[%c2_59, %c0_60, %c0_61] : memref<3x1x128xf32, #tpu.memory_space<vmem>>, vector<1x1x128xf32>
    %113 = vector.shape_cast %112 : vector<1x1x128xf32> to vector<1x128xf32>
    %114 = vector.broadcast %113 : vector<1x128xf32> to vector<128x128xf32>
    %115 = arith.addf %111, %114 : vector<128x128xf32>
    %116 = arith.addf %115, %107 : vector<128x128xf32>
    %117 = tpu.iota {dimensions = array<i32: 1>} : vector<128x128xi32>
    %c8_i32 = arith.constant 8 : i32
    %118 = vector.broadcast %c8_i32 : i32 to vector<128x128xi32>
    %119 = arith.cmpi slt, %117, %118 : vector<128x128xi32>
    %cst_62 = arith.constant -1.000000e+30 : f32
    %120 = vector.broadcast %cst_62 : f32 to vector<128x128xf32>
    %121 = arith.select %119, %116, %120 : vector<128x128xi1>, vector<128x128xf32>
    %cst_63 = arith.constant dense<0xFF800000> : vector<128xf32>
    %122 = vector.multi_reduction <maximumf>, %121, %cst_63 [1] : vector<128x128xf32> to vector<128xf32>
    %123 = vector.shape_cast %122 : vector<128xf32> to vector<128x1xf32>
    %124 = vector.broadcast %123 : vector<128x1xf32> to vector<128x128xf32>
    %125 = arith.subf %121, %124 : vector<128x128xf32>
    %126 = math.exp %125 : vector<128x128xf32>
    %cst_64 = arith.constant dense<0.000000e+00> : vector<128xf32>
    %127 = vector.multi_reduction <add>, %126, %cst_64 [1] : vector<128x128xf32> to vector<128xf32>
    %128 = vector.shape_cast %127 : vector<128xf32> to vector<128x1xf32>
    %129 = math.log %128 : vector<128x1xf32>
    %130 = vector.broadcast %123 : vector<128x1xf32> to vector<128x128xf32>
    %131 = arith.subf %121, %130 : vector<128x128xf32>
    %132 = vector.broadcast %129 : vector<128x1xf32> to vector<128x128xf32>
    %133 = arith.subf %131, %132 : vector<128x128xf32>
    %c0_65 = arith.constant 0 : index
    %c0_66 = arith.constant 0 : index
    %134 = vector.load %arg8[%c0_65, %c0_66] : memref<128x128xf32, #tpu.memory_space<vmem>>, vector<128x128xf32>
    tpu.vector_store %arg8[%c0_65, %c0_66], %133 {strides = array<i32>} : memref<128x128xf32, #tpu.memory_space<vmem>>, vector<128x128xf32>,
    return
  }
}

</mosaic_0001>

<bundles_post_ra>
// kernel: tpu_custom_call.1
= control target key start
LH: loop header
LB: loop body
LE: loop exit
PB: predicated region body
PF: predicated region fallthrough
CT: control target
= control target key end

     0   :  { %13 = vsyncpa [#allocation3], 0  ;;  %s3578_s0 = inlined_call_operand.hbm [shape: bf16[128,128], index: 0, kind: input, shape index: {}]   ;;  %s3579_s1 = inlined_call_operand.hbm [shape: f32[128,1], index: 1, kind: input, shape index: {}]   ;;  %s3580_s2 = inlined_call_operand.hbm [shape: f32[128,128], index: 2, kind: input, shape index: {}]   ;;  %s3581_s3 = inlined_call_operand.hbm [shape: f32[3,128,256], index: 3, kind: input, shape index: {}]   ;;  %s3582_s4 = inlined_call_operand.hbm [shape: f32[3,1,128], index: 4, kind: input, shape index: {}]   ;;  %s3583_s5 = inlined_call_operand.hbm [shape: f32[2,1,128], index: 5, kind: input, shape index: {}]   ;;  %s3584_s6 = inlined_call_operand.hbm [shape: f32[2,1,128], index: 6, kind: input, shape index: {}]   ;;  %s3585_s7 = inlined_call_operand.hbm [shape: f32[2,128,128], index: 7, kind: input, shape index: {}]   ;;  %s3586_s8 = inlined_call_operand.hbm [shape: f32[128,128], index: 8, kind: output, shape index: {}]  }
   0x1   :  { %14 = vsyncpa [#allocation6], 0 }
   0x2   :  { %15 = vsyncpa [#allocation9], 0 }
   0x3   :  { %16 = vsyncpa [#allocation12], 0 }
   0x4   :  { %17 = vsyncpa [#allocation15], 0 }
   0x5   :  { %18 = vsyncpa [#allocation4], 0  ;;  %s2639_s27 = smov [#allocation5]   ;;  %s2429_s9 = scalar_lea.hbm %s3579_s1, 2048 }
   0x6   :  { %s36_s28 = sshll.u32 %s2639_s27, 4  ;;  %p2430_p0 = scmp.ne.s32.totalorder %s3579_s1, %s2429_s9  ;;  %s37_s28 = int_to_ptr.vmem [resolvable:$true] %s36_s28 }
   0x7   :  { %p2433_p1 = scmp.lt.u32.totalorder %s2429_s9, %s3579_s1 }
   0x9   :  { %p2435_p2 = pnand %p2433_p1, %p2430_p0 }
   0xb   :  { %2438 = shalt.err (!%p2435_p2)
}
   0xc   :  { %s2439_s14 = scalar_lea.vmem %s37_s28, 2048  ;;  %p2444_p4 = scmp.lt.s32.totalorder %s37_s28, %s37_s28 }
   0xd   :  { %p2440_p3 = scmp.ne.s32.totalorder %s37_s28, %s2439_s14  ;;  %p2445_p5 = scmp.lt.s32.totalorder %s2439_s14, %s2439_s14 }
   0xf   :  { %p2446_p6 = por %p2445_p5, %p2444_p4 }
  0x11   :  { %p2447_p7 = pnand %p2446_p6, %p2440_p3 }
  0x13   :  { %2450 = shalt.err (!%p2447_p7)
}
  0x14   :  { %s2640_s15 = smov 128   ;;  %s2641_s16 = smov 8  }
  0x15   :  { %42 = dma.hbm_to_vmem [thread:$0]  %s3579_s1, 2048, %s37_s28, [#allocation6], %s2640_s15, %s2640_s15, %s2641_s16  }
  0x16   :  { %s2642_s19 = smov [#allocation8]   ;;  %s2451_s23 = scalar_lea.hbm %s3581_s3, 12288 }
  0x17   :  { %s60_s20 = sshll.u32 %s2642_s19, 4  ;;  %p2452_p8 = scmp.ne.s32.totalorder %s3581_s3, %s2451_s23  ;;  %s61_s20 = int_to_ptr.vmem [resolvable:$true] %s60_s20 }
  0x18   :  { %p2455_p9 = scmp.lt.u32.totalorder %s2451_s23, %s3581_s3 }
  0x1a   :  { %p2457_p10 = pnand %p2455_p9, %p2452_p8 }
  0x1c   :  { %2460 = shalt.err (!%p2457_p10)
}
  0x1d   :  { %s2461_s29 = scalar_lea.vmem %s61_s20, 12288  ;;  %p2466_p12 = scmp.lt.s32.totalorder %s61_s20, %s61_s20 }
  0x1e   :  { %p2462_p11 = scmp.ne.s32.totalorder %s61_s20, %s2461_s29  ;;  %p2467_p13 = scmp.lt.s32.totalorder %s2461_s29, %s2461_s29 }
  0x20   :  { %p2468_p0 = por %p2467_p13, %p2466_p12 }
  0x22   :  { %p2469_p1 = pnand %p2468_p0, %p2462_p11 }
  0x24   :  { %2472 = shalt.err (!%p2469_p1)
}
  0x25   :  { %s2643_s1 = smov 256   ;;  %s2644_s28 = smov 16  }
  0x26   :  { %66 = dma.hbm_to_vmem [thread:$0]  %s3581_s3, 12288, %s61_s20, [#allocation9], %s2643_s1, %s2643_s1, %s2644_s28  }
  0x27   :  { %s2645_s10 = smov [#allocation11]   ;;  %s2646_s12 = smov [#allocation2]  }
  0x28   :  { %s84_s11 = sshll.u32 %s2645_s10, 4  ;;  %s24_s13 = sshll.u32 %s2646_s12, 4  ;;  %s85_s11 = int_to_ptr.vmem [resolvable:$true] %s84_s11  ;;  %s25_s13 = int_to_ptr.vmem [resolvable:$true] %s24_s13 }
  0x29   :  { %s2473_s18 = scalar_lea.hbm %s3583_s5, 32 }
  0x2a   :  { %p2474_p2 = scmp.ne.s32.totalorder %s3583_s5, %s2473_s18  ;;  %p2477_p3 = scmp.lt.u32.totalorder %s2473_s18, %s3583_s5 }
  0x2c   :  { %p2479_p4 = pnand %p2477_p3, %p2474_p2 }
  0x2e   :  { %2482 = shalt.err (!%p2479_p4)
}
  0x2f   :  { %s2483_s3 = scalar_lea.vmem %s85_s11, 32  ;;  %p2488_p6 = scmp.lt.s32.totalorder %s85_s11, %s85_s11 }
  0x30   :  { %p2484_p5 = scmp.ne.s32.totalorder %s85_s11, %s2483_s3  ;;  %p2489_p7 = scmp.lt.s32.totalorder %s2483_s3, %s2483_s3 }
  0x32   :  { %p2490_p8 = por %p2489_p7, %p2488_p6 }
  0x34   :  { %p2491_p9 = pnand %p2490_p8, %p2484_p5 }
  0x36   :  { %2494 = shalt.err (!%p2491_p9)
}
  0x37   :  { %s2647_s20 = smov 1   ;;  %s2495_s29 = scalar_lea.hbm %s3578_s0, 1024 }
  0x38   :  { %90 = dma.hbm_to_vmem [thread:$0]  %s3583_s5, 32, %s85_s11, [#allocation12], %s2644_s28, %s2644_s28, %s2647_s20  }
  0x39   :  { %p2496_p10 = scmp.ne.s32.totalorder %s3578_s0, %s2495_s29  ;;  %p2499_p11 = scmp.lt.u32.totalorder %s2495_s29, %s3578_s0 }
  0x3b   :  { %p2501_p12 = pnand %p2499_p11, %p2496_p10 }
  0x3d   :  { %2504 = shalt.err (!%p2501_p12)
}
  0x3e   :  { %s2505_s12 = scalar_lea.vmem %s25_s13, 1024  ;;  %p2510_p0 = scmp.lt.s32.totalorder %s25_s13, %s25_s13 }
  0x3f   :  { %p2506_p13 = scmp.ne.s32.totalorder %s25_s13, %s2505_s12  ;;  %p2511_p1 = scmp.lt.s32.totalorder %s2505_s12, %s2505_s12 }
  0x41   :  { %p2512_p2 = por %p2511_p1, %p2510_p0 }
  0x43   :  { %p2513_p3 = pnand %p2512_p2, %p2506_p13 }
  0x45   :  { %2516 = shalt.err (!%p2513_p3)
}
  0x46   :  { %s2648_s5 = smov 64   ;;  %s2649_s11 = smov 4  }
  0x47   :  { %30 = dma.hbm_to_vmem [thread:$0]  %s3578_s0, 1024, %s25_s13, [#allocation3], %s2648_s5, %s2648_s5, %s2649_s11  }
  0x48   :  { %s2650_s18 = smov [#allocation7]   ;;  %s2651_s21 = smov [#allocation10]  }
  0x49   :  { %s48_s19 = sshll.u32 %s2650_s18, 4  ;;  %s72_s22 = sshll.u32 %s2651_s21, 4  ;;  %s49_s19 = int_to_ptr.vmem [resolvable:$true] %s48_s19  ;;  %s73_s22 = int_to_ptr.vmem [resolvable:$true] %s72_s22 }
  0x4a   :  { %s2517_s24 = scalar_lea.hbm %s3580_s2, 2048 }
  0x4b   :  { %p2518_p4 = scmp.ne.s32.totalorder %s3580_s2, %s2517_s24  ;;  %p2521_p5 = scmp.lt.u32.totalorder %s2517_s24, %s3580_s2 }
  0x4d   :  { %p2523_p6 = pnand %p2521_p5, %p2518_p4 }
  0x4f   :  { %2526 = shalt.err (!%p2523_p6)
}
  0x50   :  { %s2527_s0 = scalar_lea.vmem %s49_s19, 2048  ;;  %p2532_p8 = scmp.lt.s32.totalorder %s49_s19, %s49_s19 }
  0x51   :  { %p2528_p7 = scmp.ne.s32.totalorder %s49_s19, %s2527_s0  ;;  %p2533_p9 = scmp.lt.s32.totalorder %s2527_s0, %s2527_s0 }
  0x53   :  { %p2534_p10 = por %p2533_p9, %p2532_p8 }
  0x55   :  { %p2535_p11 = pnand %p2534_p10, %p2528_p7 }
  0x57   :  { %2538 = shalt.err (!%p2535_p11)
}
  0x58   :  { %54 = dma.hbm_to_vmem [thread:$0]  %s3580_s2, 2048, %s49_s19, [#allocation6], %s2640_s15, %s2640_s15, %s2641_s16  }
  0x59   :  { %s2539_s10 = scalar_lea.hbm %s3582_s4, 48 }
  0x5a   :  { %p2540_p12 = scmp.ne.s32.totalorder %s3582_s4, %s2539_s10  ;;  %p2543_p13 = scmp.lt.u32.totalorder %s2539_s10, %s3582_s4 }
  0x5c   :  { %p2545_p0 = pnand %p2543_p13, %p2540_p12 }
  0x5e   :  { %2548 = shalt.err (!%p2545_p0)
}
  0x5f   :  { %s2549_s17 = scalar_lea.vmem %s73_s22, 48  ;;  %s2553_s18 = scalar_lea.vmem %s73_s22, 64 }
  0x60   :  { %p2550_p1 = scmp.ne.s32.totalorder %s73_s22, %s2549_s17  ;;  %p2554_p2 = scmp.lt.s32.totalorder %s73_s22, %s73_s22 }
  0x61   :  { %p2555_p3 = scmp.lt.s32.totalorder %s2553_s18, %s2549_s17 }
  0x63   :  { %p2556_p4 = por %p2555_p3, %p2554_p2 }
  0x65   :  { %p2557_p5 = pnand %p2556_p4, %p2550_p1 }
  0x67   :  { %2560 = shalt.err (!%p2557_p5)
}
  0x68   :  { %78 = dma.hbm_to_vmem [thread:$0]  %s3582_s4, 48, %s73_s22, [#allocation9], %s2644_s28, %s2644_s28, %s2647_s20  }
  0x69   :  { %s2652_s21 = smov [#allocation13]   ;;  %s2653_s3 = smov [#allocation14]  }
  0x6a   :  { %s96_s23 = sshll.u32 %s2652_s21, 4  ;;  %s108_s24 = sshll.u32 %s2653_s3, 4  ;;  %s97_s23 = int_to_ptr.vmem [resolvable:$true] %s96_s23  ;;  %s109_s24 = int_to_ptr.vmem [resolvable:$true] %s108_s24 }
  0x6b   :  { %s2561_s27 = scalar_lea.hbm %s3584_s6, 32 }
  0x6c   :  { %p2562_p6 = scmp.ne.s32.totalorder %s3584_s6, %s2561_s27  ;;  %p2565_p7 = scmp.lt.u32.totalorder %s2561_s27, %s3584_s6 }
  0x6e   :  { %p2567_p8 = pnand %p2565_p7, %p2562_p6 }
  0x70   :  { %2570 = shalt.err (!%p2567_p8)
}
  0x71   :  { %s2571_s4 = scalar_lea.vmem %s97_s23, 32  ;;  %p2576_p10 = scmp.lt.s32.totalorder %s97_s23, %s97_s23 }
  0x72   :  { %p2572_p9 = scmp.ne.s32.totalorder %s97_s23, %s2571_s4  ;;  %p2577_p11 = scmp.lt.s32.totalorder %s2571_s4, %s2571_s4 }
  0x74   :  { %p2578_p12 = por %p2577_p11, %p2576_p10 }
  0x76   :  { %p2579_p13 = pnand %p2578_p12, %p2572_p9 }
  0x78   :  { %2582 = shalt.err (!%p2579_p13)
}
  0x79   :  { %102 = dma.hbm_to_vmem [thread:$0]  %s3584_s6, 32, %s97_s23, [#allocation12], %s2644_s28, %s2644_s28, %s2647_s20  }
  0x7a   :  { %s2583_s12 = scalar_lea.hbm %s3585_s7, 4096 }
  0x7b   :  { %p2584_p0 = scmp.ne.s32.totalorder %s3585_s7, %s2583_s12  ;;  %p2587_p1 = scmp.lt.u32.totalorder %s2583_s12, %s3585_s7 }
  0x7d   :  { %p2589_p2 = pnand %p2587_p1, %p2584_p0 }
  0x7f   :  { %2592 = shalt.err (!%p2589_p2)
}
  0x80   :  { %s2593_s18 = scalar_lea.vmem %s109_s24, 4096  ;;  %p2598_p4 = scmp.lt.s32.totalorder %s109_s24, %s109_s24 }
  0x81   :  { %p2594_p3 = scmp.ne.s32.totalorder %s109_s24, %s2593_s18  ;;  %p2599_p5 = scmp.lt.s32.totalorder %s2593_s18, %s2593_s18 }
  0x83   :  { %p2600_p6 = por %p2599_p5, %p2598_p4 }
  0x85   :  { %p2601_p7 = pnand %p2600_p6, %p2594_p3 }
  0x87   :  { %2604 = shalt.err (!%p2601_p7)
}
  0x88   :  { %114 = dma.hbm_to_vmem [thread:$0]  %s3585_s7, 4096, %s109_s24, [#allocation15], %s2640_s15, %s2640_s15, %s2641_s16  }
  0x89   :  { %2627 = dma.done.wait [#allocation3], 1024  }
  0x8a   :  { %2628 = vsyncadd [#allocation3], 4294966272 }
  0x8b   :  { %2629 = dma.done.wait [#allocation6], 4096  }
  0x8c   :  { %2630 = vsyncadd [#allocation6], 4294963200 }
  0x8d   :  { %2631 = dma.done.wait [#allocation9], 12336  }
  0x8e   :  { %2632 = vsyncadd [#allocation9], 4294954960 }
  0x8f   :  { %2633 = dma.done.wait [#allocation12], 64  }
  0x90   :  { %2634 = vsyncadd [#allocation12], 4294967232 }
  0x91   :  { %2635 = dma.done.wait [#allocation15], 4096  }
  0x92   :  { %2636 = vsyncadd [#allocation15], 4294963200  ;;  %v2654_v0 = vmov 0.0   ;;  %v189_v1 = vld [vmem:[#allocation8 + $0x8] sm:$0xff]  ;;  %v191_v2 = vld [vmem:[#allocation8 + $0x18] sm:$0xff]  ;;  %s2656_s7 = smov [#allocation16]  }
  0x93   :  { %284 = vmatprep.mubr.f32.mxu0 %v2654_v0  ;;  %v188_v3 = vld [vmem:[#allocation8] sm:$0xff]  ;;  %v2230_v4 = vpack.c.bf16 %v191_v2, %v189_v1  ;;  %v190_v5 = vld [vmem:[#allocation8 + $0x10] sm:$0xff]  ;;  %v193_v6 = vld [vmem:[#allocation8 + $0x28] sm:$0xff]  ;;  %s2023_s20 = sshll.u32 %s2656_s7, 4  ;;  %s2024_s20 = int_to_ptr.vmem [resolvable:$true] %s2023_s20 }
  0x94   :  { %v195_v7 = vld [vmem:[#allocation8 + $0x38] sm:$0xff]  ;;  %v2232_v8 = vpack.c.bf16 %v190_v5, %v188_v3  ;;  %v192_v10 = vld [vmem:[#allocation8 + $0x20] sm:$0xff]  ;;  %v194_v11 = vld [vmem:[#allocation8 + $0x30] sm:$0xff]  ;;  %v2655_v5 = vmov 0   ;;  %s2605_s2 = scalar_lea.vmem %s2024_s20, 2048  ;;  %p2610_p9 = scmp.lt.s32.totalorder %s2024_s20, %s2024_s20 }
  0x95   :  { %v2234_v9 = vpack.c.bf16 %v195_v7, %v193_v6  ;;  %v197_v12 = vld [vmem:[#allocation8 + $0x48] sm:$0xff]  ;;  %2231 = vmatprep.subr.bf16.mxu0 %v2230_v4  ;;  %v199_v13 = vld [vmem:[#allocation8 + $0x58] sm:$0xff]  ;;  %v2236_v14 = vpack.c.bf16 %v194_v11, %v192_v10  ;;  %v196_v16 = vld [vmem:[#allocation8 + $0x40] sm:$0xff]  ;;  %2344 = vset.pattern.permute.xlu0 %v2655_v5  ;;  %p2606_p8 = scmp.ne.s32.totalorder %s2024_s20, %s2605_s2  ;;  %p2611_p10 = scmp.lt.s32.totalorder %s2605_s2, %s2605_s2 }
  0x96   :  { %2233 = vmatpush1.bf16.msra.mxu0 %v2232_v8  ;;  %v2238_v15 = vpack.c.bf16 %v199_v13, %v197_v12  ;;  %v198_v17 = vld [vmem:[#allocation8 + $0x50] sm:$0xff]  ;;  %v201_v18 = vld [vmem:[#allocation8 + $0x68] sm:$0xff]  ;;  %v203_v19 = vld [vmem:[#allocation8 + $0x78] sm:$0xff]  ;;  %2345 = vset.pattern.permute.xlu1 %v2655_v5 }
  0x97   :  { %2235 = vmatprep.subr.bf16.mxu0 %v2234_v9  ;;  %v2240_v20 = vpack.c.bf16 %v198_v17, %v196_v16  ;;  %v2242_v21 = vpack.c.bf16 %v203_v19, %v201_v18  ;;  %v200_v22 = vld [vmem:[#allocation8 + $0x60] sm:$0xff]  ;;  %v202_v23 = vld [vmem:[#allocation8 + $0x70] sm:$0xff]  ;;  %v205_v24 = vld [vmem:[#allocation8 + $0x88] sm:$0xff]  ;;  %p2612_p11 = por %p2611_p10, %p2610_p9 }
  0x98   :  { %v207_v25 = vld [vmem:[#allocation8 + $0x98] sm:$0xff]  ;;  %v2244_v26 = vpack.c.bf16 %v202_v23, %v200_v22  ;;  %v204_v28 = vld [vmem:[#allocation8 + $0x80] sm:$0xff]  ;;  %v206_v29 = vld [vmem:[#allocation8 + $0x90] sm:$0xff] }
  0x99   :  { %v2246_v27 = vpack.c.bf16 %v207_v25, %v205_v24  ;;  %v209_v30 = vld [vmem:[#allocation8 + $0xa8] sm:$0xff]  ;;  %v211_v31 = vld [vmem:[#allocation8 + $0xb8] sm:$0xff]  ;;  %v208_v32 = vld [vmem:[#allocation8 + $0xa0] sm:$0xff]  ;;  %v2248_v34 = vpack.c.bf16 %v206_v29, %v204_v28  ;;  %p2613_p12 = pnand %p2612_p11, %p2606_p8 }
  0x9a   :  { %2237 = vmatpush1.bf16.msra.mxu0 %v2236_v14  ;;  %v210_v33 = vld [vmem:[#allocation8 + $0xb0] sm:$0xff]  ;;  %v213_v35 = vld [vmem:[#allocation8 + $0xc8] sm:$0xff]  ;;  %v215_v36 = vld [vmem:[#allocation8 + $0xd8] sm:$0xff]  ;;  %v2250_v37 = vpack.c.bf16 %v211_v31, %v209_v30 }
  0x9b   :  { %2239 = vmatprep.subr.bf16.mxu0 %v2238_v15  ;;  %v2252_v38 = vpack.c.bf16 %v210_v33, %v208_v32  ;;  %v2254_v39 = vpack.c.bf16 %v215_v36, %v213_v35  ;;  %v212_v40 = vld [vmem:[#allocation8 + $0xc0] sm:$0xff]  ;;  %v214_v41 = vld [vmem:[#allocation8 + $0xd0] sm:$0xff]  ;;  %v217_v42 = vld [vmem:[#allocation8 + $0xe8] sm:$0xff] }
  0x9c   :  { %v219_v43 = vld [vmem:[#allocation8 + $0xf8] sm:$0xff]  ;;  %v2256_v44 = vpack.c.bf16 %v214_v41, %v212_v40  ;;  %v216_v46 = vld [vmem:[#allocation8 + $0xe0] sm:$0xff]  ;;  %v218_v47 = vld [vmem:[#allocation8 + $0xf0] sm:$0xff] }
  0x9d   :  { %v2258_v45 = vpack.c.bf16 %v219_v43, %v217_v42  ;;  %v2260_v48 = vpack.c.bf16 %v218_v47, %v216_v46  ;;  %v172_v49 = vld [vmem:[#allocation7] sm:$0xff]  ;;  %v173_v50 = vld [vmem:[#allocation7 + $0x8] sm:$0xff]  ;;  %v174_v51 = vld [vmem:[#allocation7 + $0x10] sm:$0xff] }
  0x9e   :  { %2241 = vmatpush1.bf16.msra.mxu0 %v2240_v20  ;;  %v175_v52 = vld [vmem:[#allocation7 + $0x18] sm:$0xff]  ;;  %v176_v53 = vld [vmem:[#allocation7 + $0x20] sm:$0xff]  ;;  %v177_v54 = vld [vmem:[#allocation7 + $0x28] sm:$0xff] }
  0x9f   :  { %2243 = vmatprep.subr.bf16.mxu0 %v2242_v21  ;;  %v178_v55 = vld [vmem:[#allocation7 + $0x30] sm:$0xff]  ;;  %v179_v56 = vld [vmem:[#allocation7 + $0x38] sm:$0xff]  ;;  %v180_v57 = vld [vmem:[#allocation7 + $0x40] sm:$0xff] }
  0xa0   :  { %v181_v58 = vld [vmem:[#allocation7 + $0x48] sm:$0xff]  ;;  %v182_v59 = vld [vmem:[#allocation7 + $0x50] sm:$0xff]  ;;  %v183_v60 = vld [vmem:[#allocation7 + $0x58] sm:$0xff] }
  0xa1   :  { %v184_v61 = vld [vmem:[#allocation7 + $0x60] sm:$0xff]  ;;  %v185_v62 = vld [vmem:[#allocation7 + $0x68] sm:$0xff]  ;;  %v186_v63 = vld [vmem:[#allocation7 + $0x70] sm:$0xff] }
  0xa2   :  { %2245 = vmatpush1.bf16.msra.mxu0 %v2244_v26  ;;  %v187_v1 = vld [vmem:[#allocation7 + $0x78] sm:$0xff]  ;;  %v2833_v2 = vld [vmem:[#allocation2] sm:$0xff]   ;;  %v158_v4 = vld [vmem:[#allocation5 + $0x10] sm:$0xff] }
  0xa3   :  { %2247 = vmatprep.subr.bf16.mxu0 %v2246_v27  ;;  %2150 = vmatprep.mubr.bf16.mxu1 %v2833_v2  ;;  %v156_v3 = vld [vmem:[#allocation5] sm:$0xff]  ;;  %v157_v6 = vld [vmem:[#allocation5 + $0x8] sm:$0xff]  ;;  %v159_v7 = vld [vmem:[#allocation5 + $0x18] sm:$0xff] }
  0xa4   :  { %536 = vperm.xlu0 %2344, %v156_v3   ;;  %546 = vperm.xlu1 %2345, %v158_v4   ;;  %v160_v8 = vld [vmem:[#allocation5 + $0x20] sm:$0xff]  ;;  %v161_v9 = vld [vmem:[#allocation5 + $0x28] sm:$0xff]  ;;  %v162_v10 = vld [vmem:[#allocation5 + $0x30] sm:$0xff] }
  0xa5   :  { %v163_v11 = vld [vmem:[#allocation5 + $0x38] sm:$0xff]  ;;  %v164_v12 = vld [vmem:[#allocation5 + $0x40] sm:$0xff]  ;;  %v165_v13 = vld [vmem:[#allocation5 + $0x48] sm:$0xff] }
  0xa6   :  { %2249 = vmatpush1.bf16.msra.mxu0 %v2248_v34  ;;  %v166_v14 = vld [vmem:[#allocation5 + $0x50] sm:$0xff]  ;;  %v167_v15 = vld [vmem:[#allocation5 + $0x58] sm:$0xff]  ;;  %v168_v16 = vld [vmem:[#allocation5 + $0x60] sm:$0xff] }
  0xa7   :  { %2251 = vmatprep.subr.bf16.mxu0 %v2250_v37  ;;  %v169_v17 = vld [vmem:[#allocation5 + $0x68] sm:$0xff]  ;;  %v170_v18 = vld [vmem:[#allocation5 + $0x70] sm:$0xff]  ;;  %v171_v19 = vld [vmem:[#allocation5 + $0x78] sm:$0xff] }
  0xa8   :  { %541 = vperm.xlu0 %2344, %v157_v6   ;;  %551 = vperm.xlu1 %2345, %v159_v7   ;;  %v2883_v3 = vld [vmem:[#allocation2 + $0x30] sm:$0xff]   ;;  %v2887_v4 = vld [vmem:[#allocation2 + $0x38] sm:$0xff]   ;;  %v892_v5 = vld [vmem:[#allocation8 + $0x108] sm:$0xff] }
  0xa9   :  { %v894_v6 = vld [vmem:[#allocation8 + $0x118] sm:$0xff] }
  0xaa   :  { %2253 = vmatpush1.bf16.msra.mxu0 %v2252_v38  ;;  %v2262_v7 = vpack.c.bf16 %v894_v6, %v892_v5  ;;  %v916_v6 = vld [vmem:[#allocation8 + $0x1c8] sm:$0xff] }
  0xab   :  { %2255 = vmatprep.subr.bf16.mxu0 %v2254_v39 }
  0xac   :  { %556 = vperm.xlu0 %2344, %v160_v8   ;;  %561 = vperm.xlu1 %2345, %v161_v9   ;;  %v891_v8 = vld [vmem:[#allocation8 + $0x100] sm:$0xff]  ;;  %v893_v9 = vld [vmem:[#allocation8 + $0x110] sm:$0xff] }
  0xae   :  { %2257 = vmatpush1.bf16.msra.mxu0 %v2256_v44 }
  0xaf   :  { %2259 = vmatprep.subr.bf16.mxu0 %v2258_v45 }
  0xb0   :  { %566 = vperm.xlu0 %2344, %v162_v10   ;;  %571 = vperm.xlu1 %2345, %v163_v11   ;;  %v2264_v10 = vpack.c.bf16 %v893_v9, %v891_v8  ;;  %v896_v11 = vld [vmem:[#allocation8 + $0x128] sm:$0xff]  ;;  %v915_v8 = vld [vmem:[#allocation8 + $0x1c0] sm:$0xff] }
  0xb2   :  { %2261 = vmatpush1.bf16.msra.mxu0 %v2260_v48 }
  0xb4   :  { %576 = vperm.xlu0 %2344, %v164_v12   ;;  %581 = vperm.xlu1 %2345, %v165_v13   ;;  %v898_v12 = vld [vmem:[#allocation8 + $0x138] sm:$0xff] }
  0xb5   :  { %285 = vmatmul.mubr.f32.vlgmr.msra.gmra.mrb[0].mxu0 %v172_v49  ;;  %v2266_v13 = vpack.c.bf16 %v898_v12, %v896_v11  ;;  %v920_v11 = vld [vmem:[#allocation8 + $0x1e8] sm:$0xff]  ;;  %v922_v12 = vld [vmem:[#allocation8 + $0x1f8] sm:$0xff] }
  0xb6   :  { %290 = vmatprep.mubr.f32.mxu0 %v2654_v0 }
  0xb8   :  { %586 = vperm.xlu0 %2344, %v166_v14   ;;  %591 = vperm.xlu1 %2345, %v167_v15   ;;  %v895_v14 = vld [vmem:[#allocation8 + $0x120] sm:$0xff]  ;;  %v897_v15 = vld [vmem:[#allocation8 + $0x130] sm:$0xff] }
  0xb9   :  { %291 = vmatmul.mubr.f32.gmra.mrb[2].mxu0 %v173_v50 }
  0xba   :  { %296 = vmatprep.mubr.f32.mxu0 %v2654_v0 }
  0xbc   :  { %596 = vperm.xlu0 %2344, %v168_v16   ;;  %601 = vperm.xlu1 %2345, %v169_v17   ;;  %v2268_v16 = vpack.c.bf16 %v897_v15, %v895_v14  ;;  %v900_v17 = vld [vmem:[#allocation8 + $0x148] sm:$0xff]  ;;  %v2290_v14 = vpack.c.bf16 %v922_v12, %v920_v11  ;;  %v919_v15 = vld [vmem:[#allocation8 + $0x1e0] sm:$0xff] }
  0xbd   :  { %297 = vmatmul.mubr.f32.gmra.mrb[4].mxu0 %v174_v51 }
  0xbe   :  { %302 = vmatprep.mubr.f32.mxu0 %v2654_v0 }
  0xc0   :  { %606 = vperm.xlu0 %2344, %v170_v18   ;;  %611 = vperm.xlu1 %2345, %v171_v19   ;;  %v902_v18 = vld [vmem:[#allocation8 + $0x158] sm:$0xff] }
  0xc1   :  { %303 = vmatmul.mubr.f32.gmra.mrb[6].mxu0 %v175_v52  ;;  %v2270_v19 = vpack.c.bf16 %v902_v18, %v900_v17 }
  0xc2   :  { %308 = vmatprep.mubr.f32.mxu0 %v2654_v0 }
  0xc5   :  { %309 = vmatmul.mubr.f32.gmra.mrb[8].mxu0 %v176_v53 }
  0xc6   :  { %314 = vmatprep.mubr.f32.mxu0 %v2654_v0 }
  0xc9   :  { %315 = vmatmul.mubr.f32.gmra.mrb[10].mxu0 %v177_v54 }
  0xca   :  { %320 = vmatprep.mubr.f32.mxu0 %v2654_v0 }
  0xcd   :  { %321 = vmatmul.mubr.f32.gmra.mrb[12].mxu0 %v178_v55 }
  0xce   :  { %326 = vmatprep.mubr.f32.mxu0 %v2654_v0 }
  0xd1   :  { %327 = vmatmul.mubr.f32.gmra.mrb[14].mxu0 %v179_v56 }
  0xd2   :  { %332 = vmatprep.mubr.f32.mxu0 %v2654_v0 }
  0xd5   :  { %333 = vmatmul.mubr.f32.gmra.mrb[16].mxu0 %v180_v57 }
  0xd6   :  { %338 = vmatprep.mubr.f32.mxu0 %v2654_v0 }
  0xd9   :  { %339 = vmatmul.mubr.f32.gmra.mrb[18].mxu0 %v181_v58 }
  0xda   :  { %344 = vmatprep.mubr.f32.mxu0 %v2654_v0 }
  0xdd   :  { %345 = vmatmul.mubr.f32.gmra.mrb[20].mxu0 %v182_v59 }
  0xde   :  { %350 = vmatprep.mubr.f32.mxu0 %v2654_v0 }
  0xe1   :  { %351 = vmatmul.mubr.f32.gmra.mrb[22].mxu0 %v183_v60  ;;  %v2869_v60 = vld [vmem:[#allocation2 + $0x8] sm:$0xff]  }
  0xe2   :  { %356 = vmatprep.mubr.f32.mxu0 %v2654_v0 }
  0xe5   :  { %357 = vmatmul.mubr.f32.gmra.mrb[24].mxu0 %v184_v61  ;;  %v2871_v61 = vld [vmem:[#allocation2 + $0x10] sm:$0xff]  }
  0xe6   :  { %362 = vmatprep.mubr.f32.mxu0 %v2654_v0 }
  0xe9   :  { %363 = vmatmul.mubr.f32.gmra.mrb[26].mxu0 %v185_v62  ;;  %v2875_v62 = vld [vmem:[#allocation2 + $0x18] sm:$0xff]  }
  0xea   :  { %368 = vmatprep.mubr.f32.mxu0 %v2654_v0 }
  0xed   :  { %369 = vmatmul.mubr.f32.gmra.mrb[28].mxu0 %v186_v63  ;;  %v2877_v63 = vld [vmem:[#allocation2 + $0x20] sm:$0xff]  }
  0xee   :  { %374 = vmatprep.mubr.f32.mxu0 %v2654_v0 }
  0xf1   :  { %375 = vmatmul.mubr.f32.gmra.mrb[30].mxu0 %v187_v1  ;;  %v2881_v1 = vld [vmem:[#allocation2 + $0x28] sm:$0xff]  }
  0xf2   :  { %2182 = vmatprep.mubr.bf16.mxu0 %v2833_v2 }
 0x188   :  { %v286_v20 = vpop.f32.mrb[0].mxu0 }
 0x189   :  { %v2837_v21 = vpop.f32.mrb[1].mxu0 }
 0x18c   :  { %v292_v22 = vpop.f32.mrb[2].mxu0 }
 0x18d   :  { %v381_v23 = vpack.c.bf16 %v292_v22, %v286_v20  ;;  %v2839_v24 = vpop.f32.mrb[3].mxu0  ;;  %v899_v20 = vld [vmem:[#allocation8 + $0x140] sm:$0xff]  ;;  %v901_v22 = vld [vmem:[#allocation8 + $0x150] sm:$0xff] }
 0x18f   :  { %2134 = vmatprep.subr.bf16.mxu1 %v381_v23 }
 0x190   :  { %v298_v25 = vpop.f32.mrb[4].mxu0  ;;  %2135 = vmatpush3.bf16.msra.mxu1 %v381_v23  ;;  %v2272_v23 = vpack.c.bf16 %v901_v22, %v899_v20 }
 0x191   :  { %v2841_v26 = vpop.f32.mrb[5].mxu0 }
 0x194   :  { %v304_v27 = vpop.f32.mrb[6].mxu0 }
 0x195   :  { %v382_v28 = vpack.c.bf16 %v304_v27, %v298_v25  ;;  %v2843_v29 = vpop.f32.mrb[7].mxu0  ;;  %v904_v25 = vld [vmem:[#allocation8 + $0x168] sm:$0xff]  ;;  %v906_v27 = vld [vmem:[#allocation8 + $0x178] sm:$0xff] }
 0x197   :  { %2136 = vmatprep.subr.bf16.mxu1 %v382_v28 }
 0x198   :  { %v310_v30 = vpop.f32.mrb[8].mxu0  ;;  %2137 = vmatpush3.bf16.msra.mxu1 %v382_v28  ;;  %v2274_v28 = vpack.c.bf16 %v906_v27, %v904_v25 }
 0x199   :  { %v2845_v31 = vpop.f32.mrb[9].mxu0 }
 0x19c   :  { %v316_v32 = vpop.f32.mrb[10].mxu0 }
 0x19d   :  { %v383_v33 = vpack.c.bf16 %v316_v32, %v310_v30  ;;  %v2847_v34 = vpop.f32.mrb[11].mxu0  ;;  %v903_v30 = vld [vmem:[#allocation8 + $0x160] sm:$0xff]  ;;  %v905_v32 = vld [vmem:[#allocation8 + $0x170] sm:$0xff] }
 0x19f   :  { %2138 = vmatprep.subr.bf16.mxu1 %v383_v33 }
 0x1a0   :  { %v322_v35 = vpop.f32.mrb[12].mxu0  ;;  %2139 = vmatpush3.bf16.msra.mxu1 %v383_v33  ;;  %v2276_v33 = vpack.c.bf16 %v905_v32, %v903_v30 }
 0x1a1   :  { %v2849_v36 = vpop.f32.mrb[13].mxu0 }
 0x1a4   :  { %v328_v37 = vpop.f32.mrb[14].mxu0 }
 0x1a5   :  { %v384_v38 = vpack.c.bf16 %v328_v37, %v322_v35  ;;  %v2851_v39 = vpop.f32.mrb[15].mxu0  ;;  %v2891_v35 = vpop.permute.xlu0 %536  ;;  %v908_v37 = vld [vmem:[#allocation8 + $0x188] sm:$0xff] }
 0x1a7   :  { %2140 = vmatprep.subr.bf16.mxu1 %v384_v38 }
 0x1a8   :  { %v334_v40 = vpop.f32.mrb[16].mxu0  ;;  %2141 = vmatpush3.bf16.msra.mxu1 %v384_v38  ;;  %v910_v38 = vld [vmem:[#allocation8 + $0x198] sm:$0xff] }
 0x1a9   :  { %v2853_v41 = vpop.f32.mrb[17].mxu0 }
 0x1ac   :  { %v340_v42 = vpop.f32.mrb[18].mxu0 }
 0x1ad   :  { %v385_v43 = vpack.c.bf16 %v340_v42, %v334_v40  ;;  %v2855_v44 = vpop.f32.mrb[19].mxu0  ;;  %v2893_v40 = vpop.permute.xlu1 %546  ;;  %v2278_v42 = vpack.c.bf16 %v910_v38, %v908_v37 }
 0x1af   :  { %2142 = vmatprep.subr.bf16.mxu1 %v385_v43 }
 0x1b0   :  { %v346_v45 = vpop.f32.mrb[20].mxu0  ;;  %2143 = vmatpush3.bf16.msra.mxu1 %v385_v43  ;;  %v907_v43 = vld [vmem:[#allocation8 + $0x180] sm:$0xff] }
 0x1b1   :  { %v2857_v46 = vpop.f32.mrb[21].mxu0  ;;  %v2897_v5 = vpop.permute.xlu1 %551 }
 0x1b4   :  { %v352_v47 = vpop.f32.mrb[22].mxu0 }
 0x1b5   :  { %v386_v48 = vpack.c.bf16 %v352_v47, %v346_v45  ;;  %v2859_v49 = vpop.f32.mrb[23].mxu0  ;;  %v909_v45 = vld [vmem:[#allocation8 + $0x190] sm:$0xff] }
 0x1b6   :  { %v2280_v47 = vpack.c.bf16 %v909_v45, %v907_v43 }
 0x1b7   :  { %2144 = vmatprep.subr.bf16.mxu1 %v386_v48 }
 0x1b8   :  { %v358_v50 = vpop.f32.mrb[24].mxu0  ;;  %2145 = vmatpush3.bf16.msra.mxu1 %v386_v48  ;;  %v912_v48 = vld [vmem:[#allocation8 + $0x1a8] sm:$0xff] }
 0x1b9   :  { %v2861_v51 = vpop.f32.mrb[25].mxu0 }
 0x1bc   :  { %v364_v52 = vpop.f32.mrb[26].mxu0 }
 0x1bd   :  { %v387_v53 = vpack.c.bf16 %v364_v52, %v358_v50  ;;  %v2863_v54 = vpop.f32.mrb[27].mxu0  ;;  %v914_v50 = vld [vmem:[#allocation8 + $0x1b8] sm:$0xff]  ;;  %v2895_v52 = vpop.permute.xlu0 %541 }
 0x1bf   :  { %2146 = vmatprep.subr.bf16.mxu1 %v387_v53 }
 0x1c0   :  { %v370_v55 = vpop.f32.mrb[28].mxu0  ;;  %2147 = vmatpush3.bf16.msra.mxu1 %v387_v53  ;;  %v2282_v53 = vpack.c.bf16 %v914_v50, %v912_v48 }
 0x1c1   :  { %v2865_v56 = vpop.f32.mrb[29].mxu0  ;;  %v2899_v17 = vpop.permute.xlu0 %556 }
 0x1c4   :  { %v376_v57 = vpop.f32.mrb[30].mxu0 }
 0x1c5   :  { %v388_v58 = vpack.c.bf16 %v376_v57, %v370_v55  ;;  %v2867_v59 = vpop.f32.mrb[31].mxu0  ;;  %v911_v55 = vld [vmem:[#allocation8 + $0x1a0] sm:$0xff]  ;;  %v913_v57 = vld [vmem:[#allocation8 + $0x1b0] sm:$0xff]  ;;  %v2903_v20 = vpop.permute.xlu0 %566 }
 0x1c7   :  { %2148 = vmatprep.subr.bf16.mxu1 %v388_v58 }
 0x1c8   :  { %2149 = vmatpush3.bf16.msra.mxu1 %v388_v58  ;;  %v2284_v58 = vpack.c.bf16 %v913_v57, %v911_v55 }
 0x1c9   :  { %2263 = vmatprep.subr.bf16.mxu1 %v2262_v7  ;;  %v918_v7 = vld [vmem:[#allocation8 + $0x1d8] sm:$0xff]  ;;  %v2919_v48 = vpop.permute.xlu0 %576 }
 0x1ca   :  { %v2286_v9 = vpack.c.bf16 %v918_v7, %v916_v6 }
 0x1cb   :  { %2151 = vmatmul.mubr.bf16.vlgmr.msra.gmra.mrb[0].mxu1 %v2869_v60 }
 0x1cc   :  { %2154 = vmatprep.mubr.bf16.mxu1 %v2871_v61  ;;  %2265 = vmatpush1.bf16.msra.mxu1 %v2264_v10  ;;  %v917_v10 = vld [vmem:[#allocation8 + $0x1d0] sm:$0xff] }
 0x1cd   :  { %2267 = vmatprep.subr.bf16.mxu1 %v2266_v13  ;;  %v2288_v13 = vpack.c.bf16 %v917_v10, %v915_v8  ;;  %v2939_v12 = vpop.permute.xlu0 %586 }
 0x1d0   :  { %2269 = vmatpush1.bf16.msra.mxu1 %v2268_v16  ;;  %v921_v16 = vld [vmem:[#allocation8 + $0x1f0] sm:$0xff] }
 0x1d1   :  { %2271 = vmatprep.subr.bf16.mxu1 %v2270_v19  ;;  %v2292_v18 = vpack.c.bf16 %v921_v16, %v919_v15  ;;  %v2901_v19 = vpop.permute.xlu1 %561 }
 0x1d3   :  { %2155 = vmatmul.mubr.bf16.gmra.mrb[4].mxu1 %v2875_v62 }
 0x1d4   :  { %2158 = vmatprep.mubr.bf16.mxu1 %v2877_v63  ;;  %2273 = vmatpush1.bf16.msra.mxu1 %v2272_v23  ;;  %v2905_v23 = vld [vmem:[#allocation10] ss:$0 sm:$0xff] }
 0x1d5   :  { %2275 = vmatprep.subr.bf16.mxu1 %v2274_v28  ;;  %v2908_v28 = vpop.permute.xlu1 %571 }
 0x1d8   :  { %2277 = vmatpush1.bf16.msra.mxu1 %v2276_v33 }
 0x1d9   :  { %2279 = vmatprep.subr.bf16.mxu1 %v2278_v42  ;;  %v2928_v57 = vpop.permute.xlu1 %581 }
 0x1db   :  { %2159 = vmatmul.mubr.bf16.gmra.mrb[8].mxu1 %v2881_v1 }
 0x1dc   :  { %2162 = vmatprep.mubr.bf16.mxu1 %v2883_v3  ;;  %2281 = vmatpush1.bf16.msra.mxu1 %v2280_v47 }
 0x1dd   :  { %2283 = vmatprep.subr.bf16.mxu1 %v2282_v53 }
 0x1e0   :  { %2285 = vmatpush1.bf16.msra.mxu1 %v2284_v58 }
 0x1e1   :  { %2287 = vmatprep.subr.bf16.mxu1 %v2286_v9 }
 0x1e3   :  { %2163 = vmatmul.mubr.bf16.gmra.mrb[12].mxu1 %v2887_v4 }
 0x1e4   :  { %987 = vmatprep.mubr.f32.mxu1 %v2654_v0  ;;  %2289 = vmatpush1.bf16.msra.mxu1 %v2288_v13 }
 0x1e5   :  { %2291 = vmatprep.subr.bf16.mxu1 %v2290_v14 }
 0x1e8   :  { %2293 = vmatpush1.bf16.msra.mxu1 %v2292_v18  ;;  %v2948_v18 = vpop.permute.xlu1 %591 }
 0x29e   :  { %v2152_v22 = vpop.f32.mrb[0].mxu1 }
 0x29f   :  { %v616_v25 = vmul.f32 %v2152_v22, %v2893_v40  ;;  %v471_v27 = vpop.f32.mrb[1].mxu1 }
 0x2a0   :  { %v614_v30 = vmul.f32 %v2891_v35, %v471_v27  ;;  %v2153_v32 = vpop.f32.mrb[2].mxu1 }
 0x2a1   :  { %v639_v33 = vadd.f32 %v2905_v23, %v616_v25  ;;  %v617_v37 = vmul.f32 %v2153_v32, %v2897_v5  ;;  %v474_v38 = vpop.f32.mrb[3].mxu1 }
 0x2a2   :  { %v637_v42 = vadd.f32 %v2905_v23, %v614_v30  ;;  %v615_v43 = vmul.f32 %v2895_v52, %v474_v38 }
 0x2a3   :  { %v2916_v45 = vadd.f32 %v639_v33, %v2841_v26  ;;  %v640_v47 = vadd.f32 %v2905_v23, %v617_v37 }
 0x2a4   :  { %v2922_v50 = vadd.f32 %v637_v42, %v2837_v21  ;;  %v638_v53 = vadd.f32 %v2905_v23, %v615_v43  ;;  %v2961_v42 = vpop.permute.xlu0 %596 }
 0x2a5   :  { %v2926_v55 = vadd.f32 %v640_v47, %v2843_v29 }
 0x2a6   :  { %v2931_v58 = vadd.f32 %v638_v53, %v2839_v24  ;;  %v2156_v6 = vpop.f32.mrb[4].mxu1 }
 0x2a7   :  { %v620_v26 = vmul.f32 %v2156_v6, %v2903_v20  ;;  %v487_v7 = vpop.f32.mrb[5].mxu1 }
 0x2a8   :  { %v669_v8 = vadd.f32 %v2931_v58, %v2922_v50  ;;  %v618_v21 = vmul.f32 %v2899_v17, %v487_v7  ;;  %v2157_v9 = vpop.f32.mrb[6].mxu1 }
 0x2a9   :  { %v643_v10 = vadd.f32 %v2905_v23, %v620_v26  ;;  %v621_v29 = vmul.f32 %v2157_v9, %v2908_v28  ;;  %v490_v11 = vpop.f32.mrb[7].mxu1  ;;  %v2966_v26 = vpop.permute.xlu1 %601 }
 0x2aa   :  { %v670_v24 = vadd.f32 %v669_v8, %v2916_v45  ;;  %v641_v13 = vadd.f32 %v2905_v23, %v618_v21  ;;  %v619_v14 = vmul.f32 %v2901_v19, %v490_v11 }
 0x2ab   :  { %v2945_v15 = vadd.f32 %v643_v10, %v2849_v36  ;;  %v644_v16 = vadd.f32 %v2905_v23, %v621_v29 }
 0x2ac   :  { %v2951_v22 = vadd.f32 %v641_v13, %v2845_v31  ;;  %v671_v25 = vadd.f32 %v670_v24, %v2926_v55  ;;  %v642_v27 = vadd.f32 %v2905_v23, %v619_v14  ;;  %v2977_v13 = vpop.permute.xlu0 %606 }
 0x2ad   :  { %v2956_v30 = vadd.f32 %v644_v16, %v2851_v39 }
 0x2ae   :  { %v672_v32 = vadd.f32 %v671_v25, %v2951_v22  ;;  %v658_v33 = vadd.f32 %v642_v27, %v2847_v34  ;;  %v2160_v36 = vpop.f32.mrb[8].mxu1 }
 0x2af   :  { %v624_v37 = vmul.f32 %v2160_v36, %v2939_v12  ;;  %v503_v38 = vpop.f32.mrb[9].mxu1 }
 0x2b0   :  { %v673_v43 = vadd.f32 %v672_v32, %v658_v33  ;;  %v622_v31 = vmul.f32 %v2919_v48, %v503_v38  ;;  %v2161_v47 = vpop.f32.mrb[10].mxu1 }
 0x2b1   :  { %v647_v53 = vadd.f32 %v2905_v23, %v624_v37  ;;  %v625_v6 = vmul.f32 %v2161_v47, %v2948_v18  ;;  %v506_v39 = vpop.f32.mrb[11].mxu1 }
 0x2b2   :  { %v674_v7 = vadd.f32 %v673_v43, %v2945_v15  ;;  %v645_v34 = vadd.f32 %v2905_v23, %v622_v31  ;;  %v623_v8 = vmul.f32 %v2928_v57, %v506_v39 }
 0x2b3   :  { %v663_v21 = vadd.f32 %v647_v53, %v2857_v46  ;;  %v648_v9 = vadd.f32 %v2905_v23, %v625_v6  ;;  %v2981_v46 = vpop.permute.xlu1 %611 }
 0x2b4   :  { %v661_v10 = vadd.f32 %v645_v34, %v2853_v41  ;;  %v675_v29 = vadd.f32 %v674_v7, %v2956_v30  ;;  %v646_v11 = vadd.f32 %v2905_v23, %v623_v8 }
 0x2b5   :  { %v664_v24 = vadd.f32 %v648_v9, %v2859_v49 }
 0x2b6   :  { %v676_v14 = vadd.f32 %v675_v29, %v661_v10  ;;  %v662_v16 = vadd.f32 %v646_v11, %v2855_v44  ;;  %v2164_v25 = vpop.f32.mrb[12].mxu1 }
 0x2b7   :  { %v628_v27 = vmul.f32 %v2164_v25, %v2977_v13  ;;  %v519_v32 = vpop.f32.mrb[13].mxu1 }
 0x2b8   :  { %v677_v36 = vadd.f32 %v676_v14, %v662_v16  ;;  %v626_v41 = vmul.f32 %v2961_v42, %v519_v32  ;;  %v2165_v37 = vpop.f32.mrb[14].mxu1 }
 0x2b9   :  { %v651_v38 = vadd.f32 %v2905_v23, %v628_v27  ;;  %v629_v43 = vmul.f32 %v2165_v37, %v2981_v46  ;;  %v522_v49 = vpop.f32.mrb[15].mxu1 }
 0x2ba   :  { %v678_v31 = vadd.f32 %v677_v36, %v663_v21  ;;  %v649_v47 = vadd.f32 %v2905_v23, %v626_v41  ;;  %v627_v44 = vmul.f32 %v2966_v26, %v522_v49 }
 0x2bb   :  { %v667_v53 = vadd.f32 %v651_v38, %v2865_v56  ;;  %v652_v6 = vadd.f32 %v2905_v23, %v629_v43 }
 0x2bc   :  { %v665_v39 = vadd.f32 %v649_v47, %v2861_v51  ;;  %v679_v7 = vadd.f32 %v678_v31, %v664_v24  ;;  %v650_v34 = vadd.f32 %v2905_v23, %v627_v44 }
 0x2bd   :  { %v668_v8 = vadd.f32 %v652_v6, %v2867_v59 }
 0x2be   :  { %v680_v9 = vadd.f32 %v679_v7, %v665_v39  ;;  %v666_v29 = vadd.f32 %v650_v34, %v2863_v54 }
 0x2c0   :  { %v681_v11 = vadd.f32 %v680_v9, %v666_v29 }
 0x2c2   :  { %v682_v14 = vadd.f32 %v681_v11, %v667_v53 }
 0x2c4   :  { %v683_v25 = vadd.f32 %v682_v14, %v668_v8 }
 0x2c6   :  { %v684_v27 = vrot.slane %v683_v25, 4 }
 0x2c8   :  { %v685_v32 = vadd.f32 %v684_v27, %v683_v25 }
 0x2ca   :  { %v686_v36 = vrot.slane %v685_v32, 2 }
 0x2cc   :  { %v687_v41 = vadd.f32 %v686_v36, %v685_v32 }
 0x2ce   :  { %v688_v56 = vrot.slane %v687_v41, 1 }
 0x2d0   :  { %v689_v37 = vadd.f32 %v688_v56, %v687_v41 }
 0x2d2   :  { %v691_v38 = vmul.f32 0.0078125, %v689_v37 }
 0x2d4   :  { %v692_v51 = vsub.f32 %v2922_v50, %v691_v38  ;;  %v693_v43 = vsub.f32 %v2931_v58, %v691_v38  ;;  %v694_v23 = vsub.f32 %v2916_v45, %v691_v38  ;;  %v695_v59 = vsub.f32 %v2926_v55, %v691_v38 }
 0x2d5   :  { %v696_v54 = vsub.f32 %v2951_v22, %v691_v38  ;;  %v697_v49 = vsub.f32 %v658_v33, %v691_v38  ;;  %v698_v31 = vsub.f32 %v2945_v15, %v691_v38  ;;  %v699_v47 = vsub.f32 %v2956_v30, %v691_v38 }
 0x2d6   :  { %v3001_v44 = vsub.f32 %v661_v10, %v691_v38  ;;  %v3003_v6 = vsub.f32 %v662_v16, %v691_v38  ;;  %v3005_v7 = vsub.f32 %v663_v21, %v691_v38  ;;  %v3007_v50 = vsub.f32 %v664_v24, %v691_v38 }
 0x2d7   :  { %v3009_v58 = vsub.f32 %v665_v39, %v691_v38  ;;  %v705_v45 = vsub.f32 %v666_v29, %v691_v38  ;;  %v3011_v34 = vsub.f32 %v667_v53, %v691_v38  ;;  %v3013_v55 = vsub.f32 %v668_v8, %v691_v38 }
 0x2d8   :  { %v708_v22 = vmul.f32 %v692_v51, %v692_v51  ;;  %v709_v33 = vmul.f32 %v693_v43, %v693_v43  ;;  %v710_v15 = vmul.f32 %v694_v23, %v694_v23  ;;  %v711_v30 = vmul.f32 %v695_v59, %v695_v59 }
 0x2d9   :  { %v712_v11 = vmul.f32 %v696_v54, %v696_v54  ;;  %v713_v14 = vmul.f32 %v697_v49, %v697_v49  ;;  %v714_v25 = vmul.f32 %v698_v31, %v698_v31  ;;  %v715_v27 = vmul.f32 %v699_v47, %v699_v47 }
 0x2da   :  { %v724_v9 = vadd.f32 %v709_v33, %v708_v22  ;;  %v716_v53 = vmul.f32 %v3001_v44, %v3001_v44  ;;  %v717_v8 = vmul.f32 %v3003_v6, %v3003_v6  ;;  %v718_v36 = vmul.f32 %v3005_v7, %v3005_v7 }
 0x2db   :  { %v719_v56 = vmul.f32 %v3007_v50, %v3007_v50  ;;  %v720_v38 = vmul.f32 %v3009_v58, %v3009_v58  ;;  %v721_v33 = vmul.f32 %v705_v45, %v705_v45 }
 0x2dc   :  { %v725_v10 = vadd.f32 %v724_v9, %v710_v15  ;;  %v722_v9 = vmul.f32 %v3011_v34, %v3011_v34 }
 0x2de   :  { %v726_v16 = vadd.f32 %v725_v10, %v711_v30  ;;  %v723_v10 = vmul.f32 %v3013_v55, %v3013_v55 }
 0x2e0   :  { %v727_v21 = vadd.f32 %v726_v16, %v712_v11 }
 0x2e2   :  { %v728_v24 = vadd.f32 %v727_v21, %v713_v14 }
 0x2e4   :  { %v729_v39 = vadd.f32 %v728_v24, %v714_v25 }
 0x2e6   :  { %v730_v29 = vadd.f32 %v729_v39, %v715_v27 }
 0x2e8   :  { %v731_v32 = vadd.f32 %v730_v29, %v716_v53 }
 0x2ea   :  { %v732_v41 = vadd.f32 %v731_v32, %v717_v8  ;;  %v3031_v32 = vld [vmem:[#allocation11] ss:$0 sm:$0xff] }
 0x2ec   :  { %v733_v37 = vadd.f32 %v732_v41, %v718_v36 }
 0x2ee   :  { %v734_v22 = vadd.f32 %v733_v37, %v719_v56 }
 0x2f0   :  { %v735_v15 = vadd.f32 %v734_v22, %v720_v38  ;;  %v3039_v38 = vld [vmem:[#allocation13] ss:$0 sm:$0xff] }
 0x2f2   :  { %v736_v30 = vadd.f32 %v735_v15, %v721_v33 }
 0x2f4   :  { %v737_v11 = vadd.f32 %v736_v30, %v722_v9 }
 0x2f6   :  { %v738_v16 = vadd.f32 %v737_v11, %v723_v10  ;;  %v826_v10 = vld [vmem:[#allocation14] sm:$0xff] }
 0x2f7   :  { %vm842_vm0 = vcmp.ge.f32.partialorder %v826_v10, 0.5 }
 0x2f8   :  { %v739_v14 = vrot.slane %v738_v16, 4 }
 0x2fa   :  { %v740_v21 = vadd.f32 %v739_v14, %v738_v16 }
 0x2fc   :  { %v741_v25 = vrot.slane %v740_v21, 2 }
 0x2fe   :  { %v742_v24 = vadd.f32 %v741_v25, %v740_v21  ;;  %v828_v25 = vld [vmem:[#allocation14 + $0x10] sm:$0xff] }
 0x2ff   :  { %vm844_vm2 = vcmp.ge.f32.partialorder %v828_v25, 0.5 }
 0x300   :  { %v743_v27 = vrot.slane %v742_v24, 1 }
 0x302   :  { %v744_v39 = vadd.f32 %v743_v27, %v742_v24 }
 0x304   :  { %v745_v53 = vmul.f32 0.0078125, %v744_v39 }
 0x306   :  { %v746_v29 = vadd.f32 1e-05, %v745_v53 }
 0x308   :  { %2354 = vrsqrt.f32 %v746_v29  ;;  %v829_v29 = vld [vmem:[#allocation14 + $0x18] sm:$0xff] }
 0x309   :  { %vm845_vm3 = vcmp.ge.f32.partialorder %v829_v29, 0.5 }
 0x312   :  { %v3029_v8 = vpop.eup %2354 }
 0x313   :  { %v3034_v36 = vmul.f32 %v3029_v8, %v705_v45  ;;  %v748_v41 = vmul.f32 %v3029_v8, %v692_v51  ;;  %v749_v56 = vmul.f32 %v3029_v8, %v693_v43  ;;  %v750_v37 = vmul.f32 %v3029_v8, %v694_v23 }
 0x314   :  { %v751_v22 = vmul.f32 %v3029_v8, %v695_v59  ;;  %v752_v33 = vmul.f32 %v3029_v8, %v696_v54  ;;  %v753_v15 = vmul.f32 %v3029_v8, %v697_v49  ;;  %v754_v9 = vmul.f32 %v3029_v8, %v698_v31  ;;  %v827_v49 = vld [vmem:[#allocation14 + $0x8] sm:$0xff] }
 0x315   :  { %v771_v30 = vmul.f32 %v3031_v32, %v748_v41  ;;  %v772_v45 = vmul.f32 %v3031_v32, %v749_v56  ;;  %v755_v51 = vmul.f32 %v3029_v8, %v699_v47  ;;  %v773_v11 = vmul.f32 %v3031_v32, %v750_v37 }
 0x316   :  { %v774_v14 = vmul.f32 %v3031_v32, %v751_v22  ;;  %vm843_vm1 = vcmp.ge.f32.partialorder %v827_v49, 0.5  ;;  %v775_v27 = vmul.f32 %v3031_v32, %v752_v33  ;;  %v776_v56 = vmul.f32 %v3031_v32, %v753_v15  ;;  %v831_v15 = vld [vmem:[#allocation14 + $0x28] sm:$0xff]  ;;  %v832_v49 = vld [vmem:[#allocation14 + $0x30] sm:$0xff] }
 0x317   :  { %v794_v43 = vadd.f32 %v3039_v38, %v771_v30  ;;  %v795_v23 = vadd.f32 %v3039_v38, %v772_v45  ;;  %v796_v31 = vadd.f32 %v3039_v38, %v773_v11  ;;  %v830_v30 = vld [vmem:[#allocation14 + $0x20] sm:$0xff]  ;;  %v777_v45 = vmul.f32 %v3031_v32, %v754_v9 }
 0x318   :  { %v797_v24 = vadd.f32 %v3039_v38, %v774_v14  ;;  %v798_v41 = vadd.f32 %v3039_v38, %v775_v27  ;;  %v799_v33 = vadd.f32 %v3039_v38, %v776_v56  ;;  %vm846_vm4 = vcmp.ge.f32.partialorder %v830_v30, 0.5 }
 0x319   :  { %v810_v59 = vmax.f32 %v794_v43, 0.0  ;;  %v811_v16 = vmax.f32 %v795_v23, 0.0  ;;  %v812_v21 = vmax.f32 %v796_v31, 0.0  ;;  %v778_v43 = vmul.f32 %v3031_v32, %v755_v51 }
 0x31a   :  { %v813_v53 = vmax.f32 %v797_v24, 0.0  ;;  %v814_v22 = vmax.f32 %v798_v41, 0.0  ;;  %v815_v23 = vmax.f32 %v799_v33, 0.0  ;;  %v800_v11 = vadd.f32 %v3039_v38, %v777_v45 }
 0x31b   :  { %v858_v54 = vmul.f32 2.0, %v810_v59  ;;  %v859_v47 = vmul.f32 2.0, %v811_v16  ;;  %v860_v39 = vmul.f32 2.0, %v812_v21  ;;  %v756_v59 = vmul.f32 %v3029_v8, %v3001_v44 }
 0x31c   :  { %v861_v37 = vmul.f32 2.0, %v813_v53  ;;  %v862_v10 = vmul.f32 2.0, %v814_v22  ;;  %vm847_vm5 = vcmp.ge.f32.partialorder %v831_v15, 0.5  ;;  %v801_v9 = vadd.f32 %v3039_v38, %v778_v43  ;;  %v835_v22 = vld [vmem:[#allocation14 + $0x48] sm:$0xff]  ;;  %v836_v43 = vld [vmem:[#allocation14 + $0x50] sm:$0xff] }
 0x31d   :  { %2050 = vmatmul.mubr.msk.f32.vlgmr.msra.gmra.mrb[16].mxu1 %vm842_vm0, %v858_v54  ;;  %v863_v54 = vmul.f32 2.0, %v815_v23  ;;  %v816_v16 = vmax.f32 %v800_v11, 0.0  ;;  %v779_v31 = vmul.f32 %v3031_v32, %v756_v59  ;;  %v757_v51 = vmul.f32 %v3029_v8, %v3003_v6  ;;  %v837_v59 = vld [vmem:[#allocation14 + $0x58] sm:$0xff] }
 0x31e   :  { %993 = vmatprep.mubr.f32.mxu1 %v2654_v0  ;;  %vm848_vm6 = vcmp.ge.f32.partialorder %v832_v49, 0.5  ;;  %v817_v14 = vmax.f32 %v801_v9, 0.0  ;;  %v758_v24 = vmul.f32 %v3029_v8, %v3005_v7  ;;  %v759_v41 = vmul.f32 %v3029_v8, %v3007_v50 }
 0x31f   :  { %v864_v44 = vmul.f32 2.0, %v816_v16  ;;  %v802_v21 = vadd.f32 %v3039_v38, %v779_v31  ;;  %v780_v25 = vmul.f32 %v3031_v32, %v757_v51  ;;  %v760_v7 = vmul.f32 %v3029_v8, %v3009_v58  ;;  %v838_v51 = vld [vmem:[#allocation14 + $0x60] sm:$0xff] }
 0x320   :  { %v865_v27 = vmul.f32 2.0, %v817_v14  ;;  %v781_v29 = vmul.f32 %v3031_v32, %v758_v24  ;;  %v782_v33 = vmul.f32 %v3031_v32, %v759_v41  ;;  %vm851_vm9 = vcmp.ge.f32.partialorder %v835_v22, 0.5  ;;  %v840_v24 = vld [vmem:[#allocation14 + $0x70] sm:$0xff] }
 0x321   :  { %2051 = vmatmul.mubr.msk.f32.gmra.mrb[18].mxu1 %vm843_vm1, %v859_v47  ;;  %v833_v47 = vld [vmem:[#allocation14 + $0x38] sm:$0xff]  ;;  %v818_v6 = vmax.f32 %v802_v21, 0.0  ;;  %v803_v53 = vadd.f32 %v3039_v38, %v780_v25  ;;  %v783_v23 = vmul.f32 %v3031_v32, %v760_v7  ;;  %vm852_vm10 = vcmp.ge.f32.partialorder %v836_v43, 0.5 }
 0x322   :  { %999 = vmatprep.mubr.f32.mxu1 %v2654_v0  ;;  %vm849_vm7 = vcmp.ge.f32.partialorder %v833_v47, 0.5  ;;  %v804_v30 = vadd.f32 %v3039_v38, %v781_v29  ;;  %v784_v58 = vmul.f32 %v3031_v32, %v3034_v36  ;;  %vm853_vm11 = vcmp.ge.f32.partialorder %v837_v59, 0.5  ;;  %v839_v47 = vld [vmem:[#allocation14 + $0x68] sm:$0xff] }
 0x323   :  { %v866_v56 = vmul.f32 2.0, %v818_v6  ;;  %v806_v9 = vadd.f32 %v3039_v38, %v783_v23  ;;  %v763_v16 = vmul.f32 %v3029_v8, %v3013_v55  ;;  %vm854_vm12 = vcmp.ge.f32.partialorder %v838_v51, 0.5 }
 0x324   :  { %v820_v50 = vmax.f32 %v804_v30, 0.0  ;;  %v807_v36 = vadd.f32 %v3039_v38, %v784_v58  ;;  %vm855_vm13 = vcmp.ge.f32.partialorder %v839_v47, 0.5  ;;  %vm856_vm14 = vcmp.ge.f32.partialorder %v840_v24, 0.5 }
 0x325   :  { %2052 = vmatmul.mubr.msk.f32.gmra.mrb[20].mxu1 %vm844_vm2, %v860_v39  ;;  %v834_v39 = vld [vmem:[#allocation14 + $0x40] sm:$0xff]  ;;  %v822_v31 = vmax.f32 %v806_v9, 0.0  ;;  %v786_v25 = vmul.f32 %v3031_v32, %v763_v16 }
 0x326   :  { %1005 = vmatprep.mubr.f32.mxu1 %v2654_v0  ;;  %vm850_vm8 = vcmp.ge.f32.partialorder %v834_v39, 0.5  ;;  %v868_v15 = vmul.f32 2.0, %v820_v50 }
 0x329   :  { %2053 = vmatmul.mubr.msk.f32.gmra.mrb[22].mxu1 %vm845_vm3, %v861_v37  ;;  %v819_v37 = vmax.f32 %v803_v53, 0.0  ;;  %v841_v53 = vld [vmem:[#allocation14 + $0x78] sm:$0xff] }
 0x32a   :  { %1011 = vmatprep.mubr.f32.mxu1 %v2654_v0  ;;  %vm857_vm15 = vcmp.ge.f32.partialorder %v841_v53, 0.5 }
 0x32b   :  { %v867_v45 = vmul.f32 2.0, %v819_v37 }
 0x32d   :  { %2054 = vmatmul.mubr.msk.f32.gmra.mrb[24].mxu1 %vm846_vm4, %v862_v10  ;;  %v805_v10 = vadd.f32 %v3039_v38, %v782_v33 }
 0x32e   :  { %1017 = vmatprep.mubr.f32.mxu1 %v2654_v0 }
 0x32f   :  { %v821_v11 = vmax.f32 %v805_v10, 0.0 }
 0x331   :  { %2055 = vmatmul.mubr.msk.f32.gmra.mrb[26].mxu1 %vm847_vm5, %v863_v54  ;;  %v762_v54 = vmul.f32 %v3029_v8, %v3011_v34  ;;  %v869_v49 = vmul.f32 2.0, %v821_v11  ;;  %v823_v34 = vmax.f32 %v807_v36, 0.0 }
 0x332   :  { %1023 = vmatprep.mubr.f32.mxu1 %v2654_v0 }
 0x333   :  { %v785_v14 = vmul.f32 %v3031_v32, %v762_v54  ;;  %v871_v55 = vmul.f32 2.0, %v823_v34 }
 0x335   :  { %2056 = vmatmul.mubr.msk.f32.gmra.mrb[28].mxu1 %vm848_vm6, %v864_v44  ;;  %v870_v44 = vmul.f32 2.0, %v822_v31  ;;  %v808_v21 = vadd.f32 %v3039_v38, %v785_v14 }
 0x336   :  { %1029 = vmatprep.mubr.f32.mxu1 %v2654_v0 }
 0x337   :  { %v824_v8 = vmax.f32 %v808_v21, 0.0 }
 0x339   :  { %2057 = vmatmul.mubr.msk.f32.gmra.mrb[30].mxu1 %vm849_vm7, %v865_v27  ;;  %v809_v27 = vadd.f32 %v3039_v38, %v786_v25  ;;  %v872_v6 = vmul.f32 2.0, %v824_v8 }
 0x33a   :  { %1035 = vmatprep.mubr.f32.mxu1 %v2654_v0 }
 0x33b   :  { %v825_v39 = vmax.f32 %v809_v27, 0.0 }
 0x33d   :  { %2058 = vmatmul.mubr.msk.f32.gmra.mrb[32].mxu1 %vm850_vm8, %v866_v56  ;;  %v873_v32 = vmul.f32 2.0, %v825_v39 }
 0x33e   :  { %1041 = vmatprep.mubr.f32.mxu1 %v2654_v0 }
 0x341   :  { %2059 = vmatmul.mubr.msk.f32.gmra.mrb[34].mxu1 %vm851_vm9, %v867_v45 }
 0x342   :  { %1047 = vmatprep.mubr.f32.mxu1 %v2654_v0 }
 0x345   :  { %2060 = vmatmul.mubr.msk.f32.gmra.mrb[36].mxu1 %vm852_vm10, %v868_v15 }
 0x346   :  { %1053 = vmatprep.mubr.f32.mxu1 %v2654_v0 }
 0x349   :  { %2061 = vmatmul.mubr.msk.f32.gmra.mrb[38].mxu1 %vm853_vm11, %v869_v49 }
 0x34a   :  { %1059 = vmatprep.mubr.f32.mxu1 %v2654_v0 }
 0x34d   :  { %2062 = vmatmul.mubr.msk.f32.gmra.mrb[40].mxu1 %vm854_vm12, %v870_v44 }
 0x34e   :  { %1065 = vmatprep.mubr.f32.mxu1 %v2654_v0 }
 0x351   :  { %2063 = vmatmul.mubr.msk.f32.gmra.mrb[42].mxu1 %vm855_vm13, %v871_v55 }
 0x352   :  { %1071 = vmatprep.mubr.f32.mxu1 %v2654_v0 }
 0x355   :  { %2064 = vmatmul.mubr.msk.f32.gmra.mrb[44].mxu1 %vm856_vm14, %v872_v6 }
 0x356   :  { %1077 = vmatprep.mubr.f32.mxu1 %v2654_v0 }
 0x359   :  { %2065 = vmatmul.mubr.msk.f32.gmra.mrb[46].mxu1 %vm857_vm15, %v873_v32 }
 0x35a   :  { %2214 = vmatprep.mubr.bf16.mxu1 %v2833_v2 }
 0x3f0   :  { %v989_v29 = vpop.f32.mrb[16].mxu1 }
 0x3f1   :  { %v3109_v41 = vpop.f32.mrb[17].mxu1 }
 0x3f4   :  { %v995_v7 = vpop.f32.mrb[18].mxu1 }
 0x3f5   :  { %v1084_v38 = vpack.c.bf16 %v995_v7, %v989_v29  ;;  %v3111_v56 = vpop.f32.mrb[19].mxu1  ;;  %v1470_v29 = vld [vmem:[#allocation8 + $0x208] sm:$0xff]  ;;  %v1472_v7 = vld [vmem:[#allocation8 + $0x218] sm:$0xff] }
 0x3f7   :  { %2166 = vmatprep.subr.bf16.mxu0 %v1084_v38 }
 0x3f8   :  { %v1001_v37 = vpop.f32.mrb[20].mxu1  ;;  %2167 = vmatpush3.bf16.msra.mxu0 %v1084_v38  ;;  %v2294_v38 = vpack.c.bf16 %v1472_v7, %v1470_v29  ;;  %v1492_v29 = vld [vmem:[#allocation8 + $0x2b8] sm:$0xff]  ;;  %v1489_v7 = vld [vmem:[#allocation8 + $0x2a0] sm:$0xff] }
 0x3f9   :  { %v3113_v22 = vpop.f32.mrb[21].mxu1 }
 0x3fc   :  { %v1007_v30 = vpop.f32.mrb[22].mxu1 }
 0x3fd   :  { %v1085_v33 = vpack.c.bf16 %v1007_v30, %v1001_v37  ;;  %v3115_v45 = vpop.f32.mrb[23].mxu1  ;;  %v1469_v37 = vld [vmem:[#allocation8 + $0x200] sm:$0xff]  ;;  %v1471_v30 = vld [vmem:[#allocation8 + $0x210] sm:$0xff] }
 0x3ff   :  { %2168 = vmatprep.subr.bf16.mxu0 %v1085_v33 }
 0x400   :  { %v1013_v50 = vpop.f32.mrb[24].mxu1  ;;  %2169 = vmatpush3.bf16.msra.mxu0 %v1085_v33 }
 0x401   :  { %v3117_v2 = vpop.f32.mrb[25].mxu1 }
 0x404   :  { %v1019_v43 = vpop.f32.mrb[26].mxu1 }
 0x405   :  { %v1086_v10 = vpack.c.bf16 %v1019_v43, %v1013_v50  ;;  %v3119_v23 = vpop.f32.mrb[27].mxu1  ;;  %v1475_v50 = vld [vmem:[#allocation8 + $0x230] sm:$0xff] }
 0x407   :  { %2170 = vmatprep.subr.bf16.mxu0 %v1086_v10 }
 0x408   :  { %v1025_v58 = vpop.f32.mrb[28].mxu1  ;;  %2171 = vmatpush3.bf16.msra.mxu0 %v1086_v10  ;;  %v1477_v10 = vld [vmem:[#allocation8 + $0x240] sm:$0xff] }
 0x409   :  { %v3121_v15 = vpop.f32.mrb[29].mxu1 }
 0x40c   :  { %v1031_v11 = vpop.f32.mrb[30].mxu1 }
 0x40d   :  { %v1087_v59 = vpack.c.bf16 %v1031_v11, %v1025_v58  ;;  %v3123_v9 = vpop.f32.mrb[31].mxu1  ;;  %v1479_v58 = vld [vmem:[#allocation8 + $0x250] sm:$0xff] }
 0x40e   :  { %v2304_v11 = vpack.c.bf16 %v1479_v58, %v1477_v10  ;;  %v1499_v10 = vld [vmem:[#allocation8 + $0x2f0] sm:$0xff] }
 0x40f   :  { %2172 = vmatprep.subr.bf16.mxu0 %v1087_v59 }
 0x410   :  { %v1037_v54 = vpop.f32.mrb[32].mxu1  ;;  %2173 = vmatpush3.bf16.msra.mxu0 %v1087_v59  ;;  %v1482_v59 = vld [vmem:[#allocation8 + $0x268] sm:$0xff] }
 0x411   :  { %v3125_v16 = vpop.f32.mrb[33].mxu1 }
 0x414   :  { %v1043_v49 = vpop.f32.mrb[34].mxu1 }
 0x415   :  { %v1088_v31 = vpack.c.bf16 %v1043_v49, %v1037_v54  ;;  %v3127_v51 = vpop.f32.mrb[35].mxu1  ;;  %v1484_v54 = vld [vmem:[#allocation8 + $0x278] sm:$0xff] }
 0x416   :  { %v2306_v49 = vpack.c.bf16 %v1484_v54, %v1482_v59 }
 0x417   :  { %2174 = vmatprep.subr.bf16.mxu0 %v1088_v31 }
 0x418   :  { %v1049_v36 = vpop.f32.mrb[36].mxu1  ;;  %2175 = vmatpush3.bf16.msra.mxu0 %v1088_v31  ;;  %v1481_v31 = vld [vmem:[#allocation8 + $0x260] sm:$0xff] }
 0x419   :  { %v3129_v14 = vpop.f32.mrb[37].mxu1 }
 0x41c   :  { %v1055_v44 = vpop.f32.mrb[38].mxu1 }
 0x41d   :  { %v1089_v34 = vpack.c.bf16 %v1055_v44, %v1049_v36  ;;  %v3131_v47 = vpop.f32.mrb[39].mxu1  ;;  %v1483_v36 = vld [vmem:[#allocation8 + $0x270] sm:$0xff] }
 0x41e   :  { %v2308_v44 = vpack.c.bf16 %v1483_v36, %v1481_v31 }
 0x41f   :  { %2176 = vmatprep.subr.bf16.mxu0 %v1089_v34 }
 0x420   :  { %v1061_v21 = vpop.f32.mrb[40].mxu1  ;;  %2177 = vmatpush3.bf16.msra.mxu0 %v1089_v34  ;;  %v1486_v34 = vld [vmem:[#allocation8 + $0x288] sm:$0xff] }
 0x421   :  { %v3133_v25 = vpop.f32.mrb[41].mxu1 }
 0x424   :  { %v1067_v55 = vpop.f32.mrb[42].mxu1 }
 0x425   :  { %v1090_v8 = vpack.c.bf16 %v1067_v55, %v1061_v21  ;;  %v3135_v24 = vpop.f32.mrb[43].mxu1  ;;  %v1488_v21 = vld [vmem:[#allocation8 + $0x298] sm:$0xff] }
 0x426   :  { %v2310_v55 = vpack.c.bf16 %v1488_v21, %v1486_v34 }
 0x427   :  { %2178 = vmatprep.subr.bf16.mxu0 %v1090_v8 }
 0x428   :  { %v1073_v27 = vpop.f32.mrb[44].mxu1  ;;  %2179 = vmatpush3.bf16.msra.mxu0 %v1090_v8  ;;  %v1485_v8 = vld [vmem:[#allocation8 + $0x280] sm:$0xff] }
 0x429   :  { %v3137_v6 = vpop.f32.mrb[45].mxu1 }
 0x42c   :  { %v1079_v39 = vpop.f32.mrb[46].mxu1 }
 0x42d   :  { %v1091_v53 = vpack.c.bf16 %v1079_v39, %v1073_v27  ;;  %v3139_v32 = vpop.f32.mrb[47].mxu1  ;;  %v1487_v27 = vld [vmem:[#allocation8 + $0x290] sm:$0xff]  ;;  %v1490_v39 = vld [vmem:[#allocation8 + $0x2a8] sm:$0xff] }
 0x42f   :  { %2180 = vmatprep.subr.bf16.mxu0 %v1091_v53 }
 0x430   :  { %2181 = vmatpush3.bf16.msra.mxu0 %v1091_v53  ;;  %v2312_v53 = vpack.c.bf16 %v1487_v27, %v1485_v8 }
 0x431   :  { %2295 = vmatprep.subr.bf16.mxu0 %v2294_v38  ;;  %v1491_v38 = vld [vmem:[#allocation8 + $0x2b0] sm:$0xff] }
 0x433   :  { %2183 = vmatmul.mubr.bf16.vlgmr.msra.gmra.mrb[32].mxu0 %v2869_v60  ;;  %v2296_v60 = vpack.c.bf16 %v1471_v30, %v1469_v37  ;;  %v2314_v37 = vpack.c.bf16 %v1492_v29, %v1490_v39  ;;  %v1494_v30 = vld [vmem:[#allocation8 + $0x2c8] sm:$0xff] }
 0x434   :  { %2186 = vmatprep.mubr.bf16.mxu0 %v2871_v61  ;;  %v1474_v61 = vld [vmem:[#allocation8 + $0x228] sm:$0xff] }
 0x435   :  { %2297 = vmatpush1.bf16.msra.mxu0 %v2296_v60  ;;  %v1496_v60 = vld [vmem:[#allocation8 + $0x2d8] sm:$0xff] }
 0x43b   :  { %2187 = vmatmul.mubr.bf16.gmra.mrb[36].mxu0 %v2875_v62  ;;  %v1476_v62 = vld [vmem:[#allocation8 + $0x238] sm:$0xff] }
 0x43c   :  { %2190 = vmatprep.mubr.bf16.mxu0 %v2877_v63  ;;  %v2298_v33 = vpack.c.bf16 %v1476_v62, %v1474_v61  ;;  %v1473_v63 = vld [vmem:[#allocation8 + $0x220] sm:$0xff]  ;;  %v2316_v61 = vpack.c.bf16 %v1491_v38, %v1489_v7  ;;  %v2318_v62 = vpack.c.bf16 %v1496_v60, %v1494_v30 }
 0x43e   :  { %2299 = vmatprep.subr.bf16.mxu0 %v2298_v33  ;;  %v1493_v33 = vld [vmem:[#allocation8 + $0x2c0] sm:$0xff] }
 0x443   :  { %2191 = vmatmul.mubr.bf16.gmra.mrb[40].mxu0 %v2881_v1  ;;  %v2300_v1 = vpack.c.bf16 %v1475_v50, %v1473_v63  ;;  %v1495_v63 = vld [vmem:[#allocation8 + $0x2d0] sm:$0xff]  ;;  %v1498_v50 = vld [vmem:[#allocation8 + $0x2e8] sm:$0xff] }
 0x444   :  { %2194 = vmatprep.mubr.bf16.mxu0 %v2883_v3  ;;  %v1478_v3 = vld [vmem:[#allocation8 + $0x248] sm:$0xff] }
 0x445   :  { %2301 = vmatpush1.bf16.msra.mxu0 %v2300_v1  ;;  %v1500_v1 = vld [vmem:[#allocation8 + $0x2f8] sm:$0xff] }
 0x44b   :  { %2195 = vmatmul.mubr.bf16.gmra.mrb[44].mxu0 %v2887_v4  ;;  %v1480_v4 = vld [vmem:[#allocation8 + $0x258] sm:$0xff] }
 0x44c   :  { %1565 = vmatprep.mubr.f32.mxu0 %v2654_v0  ;;  %v2302_v43 = vpack.c.bf16 %v1480_v4, %v1478_v3  ;;  %v2320_v3 = vpack.c.bf16 %v1495_v63, %v1493_v33  ;;  %v2322_v4 = vpack.c.bf16 %v1500_v1, %v1498_v50 }
 0x44e   :  { %2303 = vmatprep.subr.bf16.mxu0 %v2302_v43  ;;  %v1497_v43 = vld [vmem:[#allocation8 + $0x2e0] sm:$0xff] }
 0x44f   :  { %2305 = vmatpush1.bf16.msra.mxu0 %v2304_v11  ;;  %v3149_v11 = vld [vmem:[#allocation10 + $0x1] ss:$0 sm:$0xff]  ;;  %v2324_v36 = vpack.c.bf16 %v1499_v10, %v1497_v43 }
 0x450   :  { %2307 = vmatprep.subr.bf16.mxu0 %v2306_v49 }
 0x453   :  { %2309 = vmatpush1.bf16.msra.mxu0 %v2308_v44 }
 0x454   :  { %2311 = vmatprep.subr.bf16.mxu0 %v2310_v55 }
 0x457   :  { %2313 = vmatpush1.bf16.msra.mxu0 %v2312_v53 }
 0x458   :  { %2315 = vmatprep.subr.bf16.mxu0 %v2314_v37 }
 0x45b   :  { %2317 = vmatpush1.bf16.msra.mxu0 %v2316_v61 }
 0x45c   :  { %2319 = vmatprep.subr.bf16.mxu0 %v2318_v62 }
 0x45f   :  { %2321 = vmatpush1.bf16.msra.mxu0 %v2320_v3 }
 0x460   :  { %2323 = vmatprep.subr.bf16.mxu0 %v2322_v4 }
 0x463   :  { %2325 = vmatpush1.bf16.msra.mxu0 %v2324_v36 }
 0x506   :  { %v2184_v58 = vpop.f32.mrb[32].mxu0 }
 0x507   :  { %v1191_v59 = vmul.f32 %v2184_v58, %v2893_v40  ;;  %v1126_v54 = vpop.f32.mrb[33].mxu0 }
 0x508   :  { %v1189_v49 = vmul.f32 %v1126_v54, %v2891_v35  ;;  %v2185_v31 = vpop.f32.mrb[34].mxu0 }
 0x509   :  { %v1215_v44 = vadd.f32 %v3149_v11, %v1191_v59  ;;  %v1192_v34 = vmul.f32 %v2185_v31, %v2897_v5  ;;  %v1129_v21 = vpop.f32.mrb[35].mxu0 }
 0x50a   :  { %v1213_v55 = vadd.f32 %v3149_v11, %v1189_v49  ;;  %v1190_v8 = vmul.f32 %v1129_v21, %v2895_v52 }
 0x50b   :  { %v3158_v27 = vadd.f32 %v1215_v44, %v3113_v22  ;;  %v1216_v39 = vadd.f32 %v3149_v11, %v1192_v34 }
 0x50c   :  { %v3162_v53 = vadd.f32 %v1213_v55, %v3109_v41  ;;  %v1214_v29 = vadd.f32 %v3149_v11, %v1190_v8 }
 0x50d   :  { %v3166_v7 = vadd.f32 %v1216_v39, %v3115_v45 }
 0x50e   :  { %v3169_v38 = vadd.f32 %v1214_v29, %v3111_v56  ;;  %v2188_v37 = vpop.f32.mrb[36].mxu0 }
 0x50f   :  { %v1195_v30 = vmul.f32 %v2188_v37, %v2903_v20  ;;  %v1142_v60 = vpop.f32.mrb[37].mxu0 }
 0x510   :  { %v1245_v22 = vadd.f32 %v3169_v38, %v3162_v53  ;;  %v1193_v61 = vmul.f32 %v1142_v60, %v2899_v17  ;;  %v2189_v41 = vpop.f32.mrb[38].mxu0 }
 0x511   :  { %v1219_v62 = vadd.f32 %v3149_v11, %v1195_v30  ;;  %v1196_v33 = vmul.f32 %v2189_v41, %v2908_v28  ;;  %v1145_v63 = vpop.f32.mrb[39].mxu0 }
 0x512   :  { %v1246_v45 = vadd.f32 %v1245_v22, %v3158_v27  ;;  %v1217_v56 = vadd.f32 %v3149_v11, %v1193_v61  ;;  %v1194_v50 = vmul.f32 %v1145_v63, %v2901_v19 }
 0x513   :  { %v3181_v1 = vadd.f32 %v1219_v62, %v3121_v15  ;;  %v1220_v3 = vadd.f32 %v3149_v11, %v1196_v33 }
 0x514   :  { %v1233_v4 = vadd.f32 %v1217_v56, %v3117_v2  ;;  %v1247_v43 = vadd.f32 %v1246_v45, %v3166_v7  ;;  %v1218_v10 = vadd.f32 %v3149_v11, %v1194_v50 }
 0x515   :  { %v1236_v58 = vadd.f32 %v1220_v3, %v3123_v9 }
 0x516   :  { %v1248_v59 = vadd.f32 %v1247_v43, %v1233_v4  ;;  %v1234_v54 = vadd.f32 %v1218_v10, %v3119_v23  ;;  %v2192_v49 = vpop.f32.mrb[40].mxu0 }
 0x517   :  { %v1199_v31 = vmul.f32 %v2192_v49, %v2939_v12  ;;  %v1158_v36 = vpop.f32.mrb[41].mxu0 }
 0x518   :  { %v1249_v44 = vadd.f32 %v1248_v59, %v1234_v54  ;;  %v1197_v15 = vmul.f32 %v1158_v36, %v2919_v48  ;;  %v2193_v34 = vpop.f32.mrb[42].mxu0 }
 0x519   :  { %v1223_v21 = vadd.f32 %v3149_v11, %v1199_v31  ;;  %v1200_v2 = vmul.f32 %v2193_v34, %v2948_v18  ;;  %v1161_v55 = vpop.f32.mrb[43].mxu0 }
 0x51a   :  { %v1250_v8 = vadd.f32 %v1249_v44, %v3181_v1  ;;  %v1221_v9 = vadd.f32 %v3149_v11, %v1197_v15  ;;  %v1198_v39 = vmul.f32 %v1161_v55, %v2928_v57 }
 0x51b   :  { %v1239_v23 = vadd.f32 %v1223_v21, %v3129_v14  ;;  %v1224_v29 = vadd.f32 %v3149_v11, %v1200_v2 }
 0x51c   :  { %v1237_v37 = vadd.f32 %v1221_v9, %v3125_v16  ;;  %v1251_v30 = vadd.f32 %v1250_v8, %v1236_v58  ;;  %v1222_v60 = vadd.f32 %v3149_v11, %v1198_v39 }
 0x51d   :  { %v1240_v22 = vadd.f32 %v1224_v29, %v3131_v47 }
 0x51e   :  { %v1252_v61 = vadd.f32 %v1251_v30, %v1237_v37  ;;  %v1238_v41 = vadd.f32 %v1222_v60, %v3127_v51  ;;  %v2196_v62 = vpop.f32.mrb[44].mxu0 }
 0x51f   :  { %v1203_v33 = vmul.f32 %v2196_v62, %v2977_v13  ;;  %v1174_v63 = vpop.f32.mrb[45].mxu0 }
 0x520   :  { %v1253_v45 = vadd.f32 %v1252_v61, %v1238_v41  ;;  %v1201_v56 = vmul.f32 %v1174_v63, %v2961_v42  ;;  %v2197_v14 = vpop.f32.mrb[46].mxu0 }
 0x521   :  { %v1227_v50 = vadd.f32 %v3149_v11, %v1203_v33  ;;  %v1204_v16 = vmul.f32 %v2197_v14, %v2981_v46  ;;  %v1177_v3 = vpop.f32.mrb[47].mxu0 }
 0x522   :  { %v1254_v43 = vadd.f32 %v1253_v45, %v1239_v23  ;;  %v1225_v10 = vadd.f32 %v3149_v11, %v1201_v56  ;;  %v1202_v47 = vmul.f32 %v1177_v3, %v2966_v26 }
 0x523   :  { %v1243_v51 = vadd.f32 %v1227_v50, %v3137_v6  ;;  %v1228_v59 = vadd.f32 %v3149_v11, %v1204_v16 }
 0x524   :  { %v1241_v49 = vadd.f32 %v1225_v10, %v3133_v25  ;;  %v1255_v31 = vadd.f32 %v1254_v43, %v1240_v22  ;;  %v1226_v36 = vadd.f32 %v3149_v11, %v1202_v47 }
 0x525   :  { %v1244_v44 = vadd.f32 %v1228_v59, %v3139_v32 }
 0x526   :  { %v1256_v15 = vadd.f32 %v1255_v31, %v1241_v49  ;;  %v1242_v34 = vadd.f32 %v1226_v36, %v3135_v24 }
 0x528   :  { %v1257_v21 = vadd.f32 %v1256_v15, %v1242_v34 }
 0x52a   :  { %v1258_v2 = vadd.f32 %v1257_v21, %v1243_v51 }
 0x52c   :  { %v1259_v55 = vadd.f32 %v1258_v2, %v1244_v44 }
 0x52e   :  { %v1260_v8 = vrot.slane %v1259_v55, 4 }
 0x530   :  { %v1261_v9 = vadd.f32 %v1260_v8, %v1259_v55 }
 0x532   :  { %v1262_v39 = vrot.slane %v1261_v9, 2 }
 0x534   :  { %v1263_v29 = vadd.f32 %v1262_v39, %v1261_v9 }
 0x536   :  { %v1264_v6 = vrot.slane %v1263_v29, 1 }
 0x538   :  { %v1265_v30 = vadd.f32 %v1264_v6, %v1263_v29 }
 0x53a   :  { %v1266_v60 = vmul.f32 0.0078125, %v1265_v30 }
 0x53c   :  { %v1267_v25 = vsub.f32 %v3162_v53, %v1266_v60  ;;  %v1268_v61 = vsub.f32 %v3169_v38, %v1266_v60  ;;  %v1269_v11 = vsub.f32 %v3158_v27, %v1266_v60  ;;  %v1270_v32 = vsub.f32 %v3166_v7, %v1266_v60 }
 0x53d   :  { %v1271_v62 = vsub.f32 %v1233_v4, %v1266_v60  ;;  %v1272_v24 = vsub.f32 %v1234_v54, %v1266_v60  ;;  %v1273_v33 = vsub.f32 %v3181_v1, %v1266_v60  ;;  %v1274_v63 = vsub.f32 %v1236_v58, %v1266_v60 }
 0x53e   :  { %v3219_v45 = vsub.f32 %v1237_v37, %v1266_v60  ;;  %v3221_v56 = vsub.f32 %v1238_v41, %v1266_v60  ;;  %v3223_v14 = vsub.f32 %v1239_v23, %v1266_v60  ;;  %v3225_v50 = vsub.f32 %v1240_v22, %v1266_v60 }
 0x53f   :  { %v3227_v53 = vsub.f32 %v1241_v49, %v1266_v60  ;;  %v1280_v38 = vsub.f32 %v1242_v34, %v1266_v60  ;;  %v3229_v16 = vsub.f32 %v1243_v51, %v1266_v60  ;;  %v3231_v27 = vsub.f32 %v1244_v44, %v1266_v60 }
 0x540   :  { %v1283_v7 = vmul.f32 %v1267_v25, %v1267_v25  ;;  %v1284_v4 = vmul.f32 %v1268_v61, %v1268_v61  ;;  %v1285_v54 = vmul.f32 %v1269_v11, %v1269_v11  ;;  %v1286_v58 = vmul.f32 %v1270_v32, %v1270_v32 }
 0x541   :  { %v1287_v3 = vmul.f32 %v1271_v62, %v1271_v62  ;;  %v1288_v43 = vmul.f32 %v1272_v24, %v1272_v24  ;;  %v1289_v10 = vmul.f32 %v1273_v33, %v1273_v33  ;;  %v1290_v47 = vmul.f32 %v1274_v63, %v1274_v63 }
 0x542   :  { %v1299_v1 = vadd.f32 %v1284_v4, %v1283_v7  ;;  %v1291_v51 = vmul.f32 %v3219_v45, %v3219_v45  ;;  %v1292_v31 = vmul.f32 %v3221_v56, %v3221_v56  ;;  %v1293_v44 = vmul.f32 %v3223_v14, %v3223_v14 }
 0x543   :  { %v1294_v34 = vmul.f32 %v3225_v50, %v3225_v50  ;;  %v1295_v2 = vmul.f32 %v3227_v53, %v3227_v53  ;;  %v1296_v8 = vmul.f32 %v1280_v38, %v1280_v38  ;;  %v1297_v39 = vmul.f32 %v3229_v16, %v3229_v16 }
 0x544   :  { %v1300_v37 = vadd.f32 %v1299_v1, %v1285_v54  ;;  %v1298_v6 = vmul.f32 %v3231_v27, %v3231_v27 }
 0x546   :  { %v1301_v41 = vadd.f32 %v1300_v37, %v1286_v58 }
 0x548   :  { %v1302_v23 = vadd.f32 %v1301_v41, %v1287_v3 }
 0x54a   :  { %v1303_v22 = vadd.f32 %v1302_v23, %v1288_v43  ;;  %v3249_v23 = vld [vmem:[#allocation11 + $0x1] ss:$0 sm:$0xff] }
 0x54c   :  { %v1304_v59 = vadd.f32 %v1303_v22, %v1289_v10 }
 0x54e   :  { %v1305_v49 = vadd.f32 %v1304_v59, %v1290_v47 }
 0x550   :  { %v1306_v36 = vadd.f32 %v1305_v49, %v1291_v51  ;;  %v3257_v51 = vld [vmem:[#allocation13 + $0x1] ss:$0 sm:$0xff] }
 0x552   :  { %v1307_v15 = vadd.f32 %v1306_v36, %v1292_v31 }
 0x554   :  { %v1308_v21 = vadd.f32 %v1307_v15, %v1293_v44 }
 0x556   :  { %v1309_v55 = vadd.f32 %v1308_v21, %v1294_v34  ;;  %v1404_v34 = vld [vmem:[#allocation14 + $0x80] sm:$0xff] }
 0x557   :  { %vm1420_vm0 = vcmp.ge.f32.partialorder %v1404_v34, 0.5 }
 0x558   :  { %v1310_v9 = vadd.f32 %v1309_v55, %v1295_v2 }
 0x55a   :  { %v1311_v29 = vadd.f32 %v1310_v9, %v1296_v8  ;;  %v1406_v9 = vld [vmem:[#allocation14 + $0x90] sm:$0xff] }
 0x55b   :  { %vm1422_vm2 = vcmp.ge.f32.partialorder %v1406_v9, 0.5 }
 0x55c   :  { %v1312_v30 = vadd.f32 %v1311_v29, %v1297_v39 }
 0x55e   :  { %v1313_v60 = vadd.f32 %v1312_v30, %v1298_v6 }
 0x560   :  { %v1314_v7 = vrot.slane %v1313_v60, 4 }
 0x562   :  { %v1315_v4 = vadd.f32 %v1314_v7, %v1313_v60  ;;  %v1407_v60 = vld [vmem:[#allocation14 + $0x98] sm:$0xff] }
 0x563   :  { %vm1423_vm3 = vcmp.ge.f32.partialorder %v1407_v60, 0.5  ;;  %v1414_v60 = vld [vmem:[#allocation14 + $0xd0] sm:$0xff] }
 0x564   :  { %v1316_v54 = vrot.slane %v1315_v4, 2  ;;  %vm1430_vm10 = vcmp.ge.f32.partialorder %v1414_v60, 0.5 }
 0x566   :  { %v1317_v1 = vadd.f32 %v1316_v54, %v1315_v4 }
 0x568   :  { %v1318_v58 = vrot.slane %v1317_v1, 1 }
 0x56a   :  { %v1319_v37 = vadd.f32 %v1318_v58, %v1317_v1  ;;  %v1408_v58 = vld [vmem:[#allocation14 + $0xa0] sm:$0xff] }
 0x56b   :  { %vm1424_vm4 = vcmp.ge.f32.partialorder %v1408_v58, 0.5  ;;  %v1415_v58 = vld [vmem:[#allocation14 + $0xd8] sm:$0xff] }
 0x56c   :  { %v1320_v3 = vmul.f32 0.0078125, %v1319_v37  ;;  %vm1431_vm11 = vcmp.ge.f32.partialorder %v1415_v58, 0.5 }
 0x56e   :  { %v1321_v41 = vadd.f32 1e-05, %v1320_v3 }
 0x570   :  { %2356 = vrsqrt.f32 %v1321_v41 }
 0x57a   :  { %v3247_v43 = vpop.eup %2356 }
 0x57b   :  { %v3252_v10 = vmul.f32 %v3247_v43, %v1280_v38  ;;  %v1323_v22 = vmul.f32 %v3247_v43, %v1267_v25  ;;  %v1324_v47 = vmul.f32 %v3247_v43, %v1268_v61  ;;  %v1325_v59 = vmul.f32 %v3247_v43, %v1269_v11 }
 0x57c   :  { %v1326_v49 = vmul.f32 %v3247_v43, %v1270_v32  ;;  %v1327_v31 = vmul.f32 %v3247_v43, %v1271_v62  ;;  %v1328_v36 = vmul.f32 %v3247_v43, %v1272_v24  ;;  %v1329_v44 = vmul.f32 %v3247_v43, %v1273_v33  ;;  %v1405_v24 = vld [vmem:[#allocation14 + $0x88] sm:$0xff] }
 0x57d   :  { %v1347_v15 = vmul.f32 %v3249_v23, %v1323_v22  ;;  %v1348_v38 = vmul.f32 %v3249_v23, %v1324_v47  ;;  %v1330_v25 = vmul.f32 %v3247_v43, %v1274_v63  ;;  %v1349_v21 = vmul.f32 %v3249_v23, %v1325_v59  ;;  %v1409_v59 = vld [vmem:[#allocation14 + $0xa8] sm:$0xff] }
 0x57e   :  { %v1350_v55 = vmul.f32 %v3249_v23, %v1326_v49  ;;  %vm1421_vm1 = vcmp.ge.f32.partialorder %v1405_v24, 0.5  ;;  %v1351_v29 = vmul.f32 %v3249_v23, %v1327_v31  ;;  %v1352_v4 = vmul.f32 %v3249_v23, %v1328_v36  ;;  %v1412_v24 = vld [vmem:[#allocation14 + $0xc0] sm:$0xff] }
 0x57f   :  { %v1371_v61 = vadd.f32 %v3257_v51, %v1347_v15  ;;  %v1372_v11 = vadd.f32 %v3257_v51, %v1348_v38  ;;  %v1373_v33 = vadd.f32 %v3257_v51, %v1349_v21  ;;  %v1353_v3 = vmul.f32 %v3249_v23, %v1329_v44  ;;  %v1410_v38 = vld [vmem:[#allocation14 + $0xb0] sm:$0xff] }
 0x580   :  { %v1374_v39 = vadd.f32 %v3257_v51, %v1350_v55  ;;  %v1375_v7 = vadd.f32 %v3257_v51, %v1351_v29  ;;  %v1376_v37 = vadd.f32 %v3257_v51, %v1352_v4  ;;  %v1354_v41 = vmul.f32 %v3249_v23, %v1330_v25 }
 0x581   :  { %v1387_v32 = vmax.f32 %v1371_v61, 0.0  ;;  %v1388_v2 = vmax.f32 %v1372_v11, 0.0  ;;  %v1389_v8 = vmax.f32 %v1373_v33, 0.0  ;;  %v1377_v49 = vadd.f32 %v3257_v51, %v1353_v3  ;;  %v1411_v11 = vld [vmem:[#allocation14 + $0xb8] sm:$0xff] }
 0x582   :  { %v1390_v30 = vmax.f32 %v1374_v39, 0.0  ;;  %v1391_v1 = vmax.f32 %v1375_v7, 0.0  ;;  %v1392_v47 = vmax.f32 %v1376_v37, 0.0  ;;  %v1331_v31 = vmul.f32 %v3247_v43, %v3219_v45  ;;  %v1413_v39 = vld [vmem:[#allocation14 + $0xc8] sm:$0xff] }
 0x583   :  { %v1436_v62 = vmul.f32 2.0, %v1387_v32  ;;  %v1437_v63 = vmul.f32 2.0, %v1388_v2  ;;  %v1438_v6 = vmul.f32 2.0, %v1389_v8  ;;  %vm1425_vm5 = vcmp.ge.f32.partialorder %v1409_v59, 0.5  ;;  %v1416_v59 = vld [vmem:[#allocation14 + $0xe0] sm:$0xff] }
 0x584   :  { %v1439_v54 = vmul.f32 2.0, %v1390_v30  ;;  %v1440_v22 = vmul.f32 2.0, %v1391_v1  ;;  %v1378_v36 = vadd.f32 %v3257_v51, %v1354_v41  ;;  %v1441_v44 = vmul.f32 2.0, %v1392_v47 }
 0x585   :  { %2069 = vmatmul.mubr.msk.f32.vlgmr.msra.gmra.mrb[48].mxu0 %vm1420_vm0, %v1436_v62  ;;  %v1393_v15 = vmax.f32 %v1377_v49, 0.0  ;;  %v1355_v61 = vmul.f32 %v3249_v23, %v1331_v31  ;;  %v1332_v25 = vmul.f32 %v3247_v43, %v3221_v56  ;;  %vm1426_vm6 = vcmp.ge.f32.partialorder %v1410_v38, 0.5  ;;  %v1418_v38 = vld [vmem:[#allocation14 + $0xf0] sm:$0xff] }
 0x586   :  { %1571 = vmatprep.mubr.f32.mxu0 %v2654_v0  ;;  %v1394_v34 = vmax.f32 %v1378_v36, 0.0  ;;  %v1333_v62 = vmul.f32 %v3247_v43, %v3223_v14  ;;  %vm1427_vm7 = vcmp.ge.f32.partialorder %v1411_v11, 0.5  ;;  %vm1428_vm8 = vcmp.ge.f32.partialorder %v1412_v24, 0.5  ;;  %v1417_v36 = vld [vmem:[#allocation14 + $0xe8] sm:$0xff] }
 0x587   :  { %v1442_v45 = vmul.f32 2.0, %v1393_v15  ;;  %v1379_v21 = vadd.f32 %v3257_v51, %v1355_v61  ;;  %v1356_v32 = vmul.f32 %v3249_v23, %v1332_v25  ;;  %v1335_v14 = vmul.f32 %v3247_v43, %v3227_v53 }
 0x588   :  { %v1443_v2 = vmul.f32 2.0, %v1394_v34  ;;  %v1357_v55 = vmul.f32 %v3249_v23, %v1333_v62  ;;  %vm1429_vm9 = vcmp.ge.f32.partialorder %v1413_v39, 0.5  ;;  %v1360_v53 = vmul.f32 %v3249_v23, %v3252_v10 }
 0x589   :  { %2070 = vmatmul.mubr.msk.f32.gmra.mrb[50].mxu0 %vm1421_vm1, %v1437_v63  ;;  %v1395_v56 = vmax.f32 %v1379_v21, 0.0  ;;  %v1380_v33 = vadd.f32 %v3257_v51, %v1356_v32  ;;  %v1334_v63 = vmul.f32 %v3247_v43, %v3225_v50  ;;  %v1359_v4 = vmul.f32 %v3249_v23, %v1335_v14 }
 0x58a   :  { %1577 = vmatprep.mubr.f32.mxu0 %v2654_v0  ;;  %v1381_v29 = vadd.f32 %v3257_v51, %v1357_v55  ;;  %v1337_v3 = vmul.f32 %v3247_v43, %v3229_v16  ;;  %v1338_v41 = vmul.f32 %v3247_v43, %v3231_v27  ;;  %v1384_v10 = vadd.f32 %v3257_v51, %v1360_v53 }
 0x58b   :  { %v1444_v8 = vmul.f32 2.0, %v1395_v56  ;;  %v1396_v9 = vmax.f32 %v1380_v33, 0.0  ;;  %v1383_v37 = vadd.f32 %v3257_v51, %v1359_v4  ;;  %vm1432_vm12 = vcmp.ge.f32.partialorder %v1416_v59, 0.5 }
 0x58c   :  { %v1397_v50 = vmax.f32 %v1381_v29, 0.0  ;;  %v1361_v49 = vmul.f32 %v3249_v23, %v1337_v3  ;;  %v1400_v16 = vmax.f32 %v1384_v10, 0.0  ;;  %v1362_v15 = vmul.f32 %v3249_v23, %v1338_v41 }
 0x58d   :  { %2071 = vmatmul.mubr.msk.f32.gmra.mrb[52].mxu0 %vm1422_vm2, %v1438_v6  ;;  %v1358_v6 = vmul.f32 %v3249_v23, %v1334_v63  ;;  %v1445_v30 = vmul.f32 2.0, %v1396_v9  ;;  %v1399_v47 = vmax.f32 %v1383_v37, 0.0  ;;  %vm1433_vm13 = vcmp.ge.f32.partialorder %v1417_v36, 0.5 }
 0x58e   :  { %1583 = vmatprep.mubr.f32.mxu0 %v2654_v0  ;;  %v1449_v27 = vmul.f32 2.0, %v1400_v16  ;;  %v1386_v61 = vadd.f32 %v3257_v51, %v1362_v15  ;;  %vm1434_vm14 = vcmp.ge.f32.partialorder %v1418_v38, 0.5  ;;  %v2424_v38 = vld [vmem:[#allocation2 + $0x18] sm:$0xff]  }
 0x58f   :  { %v1382_v7 = vadd.f32 %v3257_v51, %v1358_v6  ;;  %v1448_v31 = vmul.f32 2.0, %v1399_v47 }
 0x590   :  { %v1402_v34 = vmax.f32 %v1386_v61, 0.0  ;;  %v2425_v61 = vld [vmem:[#allocation2 + $0x20] sm:$0xff]  }
 0x591   :  { %2072 = vmatmul.mubr.msk.f32.gmra.mrb[54].mxu0 %vm1423_vm3, %v1439_v54  ;;  %v1446_v54 = vmul.f32 2.0, %v1397_v50  ;;  %v1398_v1 = vmax.f32 %v1382_v7, 0.0 }
 0x592   :  { %1589 = vmatprep.mubr.f32.mxu0 %v2654_v0  ;;  %v1451_v23 = vmul.f32 2.0, %v1402_v34  ;;  %v2427_v34 = vld [vmem:[#allocation2 + $0x30] sm:$0xff]  }
 0x595   :  { %2073 = vmatmul.mubr.msk.f32.gmra.mrb[56].mxu0 %vm1424_vm4, %v1440_v22  ;;  %v1447_v22 = vmul.f32 2.0, %v1398_v1 }
 0x596   :  { %1595 = vmatprep.mubr.f32.mxu0 %v2654_v0 }
 0x599   :  { %2074 = vmatmul.mubr.msk.f32.gmra.mrb[58].mxu0 %vm1425_vm5, %v1441_v44  ;;  %v1385_v44 = vadd.f32 %v3257_v51, %v1361_v49 }
 0x59a   :  { %1601 = vmatprep.mubr.f32.mxu0 %v2654_v0 }
 0x59b   :  { %v1401_v43 = vmax.f32 %v1385_v44, 0.0 }
 0x59d   :  { %2075 = vmatmul.mubr.msk.f32.gmra.mrb[60].mxu0 %vm1426_vm6, %v1442_v45  ;;  %v1450_v25 = vmul.f32 2.0, %v1401_v43  ;;  %v1419_v45 = vld [vmem:[#allocation14 + $0xf8] sm:$0xff]  ;;  %v2423_v43 = vld [vmem:[#allocation2 + $0x10] sm:$0xff]  }
 0x59e   :  { %1607 = vmatprep.mubr.f32.mxu0 %v2654_v0  ;;  %vm1435_vm15 = vcmp.ge.f32.partialorder %v1419_v45, 0.5  ;;  %v2428_v45 = vld [vmem:[#allocation2 + $0x38] sm:$0xff]  }
 0x5a1   :  { %2076 = vmatmul.mubr.msk.f32.gmra.mrb[62].mxu0 %vm1427_vm7, %v1443_v2 }
 0x5a2   :  { %1613 = vmatprep.mubr.f32.mxu0 %v2654_v0 }
 0x5a5   :  { %2077 = vmatmul.mubr.msk.f32.gmra.mrb[64].mxu0 %vm1428_vm8, %v1444_v8 }
 0x5a6   :  { %1619 = vmatprep.mubr.f32.mxu0 %v2654_v0 }
 0x5a9   :  { %2078 = vmatmul.mubr.msk.f32.gmra.mrb[66].mxu0 %vm1429_vm9, %v1445_v30 }
 0x5aa   :  { %1625 = vmatprep.mubr.f32.mxu0 %v2654_v0 }
 0x5ad   :  { %2079 = vmatmul.mubr.msk.f32.gmra.mrb[68].mxu0 %vm1430_vm10, %v1446_v54 }
 0x5ae   :  { %1631 = vmatprep.mubr.f32.mxu0 %v2654_v0 }
 0x5b1   :  { %2080 = vmatmul.mubr.msk.f32.gmra.mrb[70].mxu0 %vm1431_vm11, %v1447_v22 }
 0x5b2   :  { %1637 = vmatprep.mubr.f32.mxu0 %v2654_v0 }
 0x5b5   :  { %2081 = vmatmul.mubr.msk.f32.gmra.mrb[72].mxu0 %vm1432_vm12, %v1448_v31 }
 0x5b6   :  { %1643 = vmatprep.mubr.f32.mxu0 %v2654_v0 }
 0x5b9   :  { %2082 = vmatmul.mubr.msk.f32.gmra.mrb[74].mxu0 %vm1433_vm13, %v1449_v27  ;;  %v2422_v27 = vld [vmem:[#allocation2 + $0x8] sm:$0xff]  }
 0x5ba   :  { %1649 = vmatprep.mubr.f32.mxu0 %v2654_v0 }
 0x5bd   :  { %2083 = vmatmul.mubr.msk.f32.gmra.mrb[76].mxu0 %vm1434_vm14, %v1450_v25  ;;  %v2426_v25 = vld [vmem:[#allocation2 + $0x28] sm:$0xff]  }
 0x5be   :  { %1655 = vmatprep.mubr.f32.mxu0 %v2654_v0 }
 0x5c1   :  { %2084 = vmatmul.mubr.msk.f32.gmra.mrb[78].mxu0 %vm1435_vm15, %v1451_v23  ;;  %v1823_v23 = vlaneseq }
 0x658   :  { %v1567_v11 = vpop.f32.mrb[48].mxu0 }
 0x659   :  { %v3326_v21 = vpop.f32.mrb[49].mxu0 }
 0x65c   :  { %v1573_v32 = vpop.f32.mrb[50].mxu0 }
 0x65d   :  { %v1662_v62 = vpack.c.bf16 %v1573_v32, %v1567_v11  ;;  %v3328_v2 = vpop.f32.mrb[51].mxu0  ;;  %v3358_v32 = vld [vmem:[#allocation10 + $0x2] ss:$0 sm:$0xff] }
 0x65f   :  { %2198 = vmatprep.subr.bf16.mxu1 %v1662_v62 }
 0x660   :  { %v1579_v51 = vpop.f32.mrb[52].mxu0  ;;  %2199 = vmatpush3.bf16.msra.mxu1 %v1662_v62  ;;  %v3360_v62 = vand.u32 127, %v1823_v23 }
 0x661   :  { %v3330_v56 = vpop.f32.mrb[53].mxu0 }
 0x662   :  { %vm1825_vm0 = vcmp.lt.s32.totalorder %v3360_v62, 8 }
 0x664   :  { %v1585_v24 = vpop.f32.mrb[54].mxu0 }
 0x665   :  { %v1663_v33 = vpack.c.bf16 %v1585_v24, %v1579_v51  ;;  %v3332_v55 = vpop.f32.mrb[55].mxu0 }
 0x667   :  { %2200 = vmatprep.subr.bf16.mxu1 %v1663_v33 }
 0x668   :  { %v1591_v0 = vpop.f32.mrb[56].mxu0  ;;  %2201 = vmatpush3.bf16.msra.mxu1 %v1663_v33 }
 0x669   :  { %v3334_v63 = vpop.f32.mrb[57].mxu0 }
 0x66c   :  { %v1597_v14 = vpop.f32.mrb[58].mxu0 }
 0x66d   :  { %v1664_v8 = vpack.c.bf16 %v1597_v14, %v1591_v0  ;;  %v3336_v9 = vpop.f32.mrb[59].mxu0 }
 0x66f   :  { %2202 = vmatprep.subr.bf16.mxu1 %v1664_v8 }
 0x670   :  { %v1603_v39 = vpop.f32.mrb[60].mxu0  ;;  %2203 = vmatpush3.bf16.msra.mxu1 %v1664_v8 }
 0x671   :  { %v3338_v29 = vpop.f32.mrb[61].mxu0 }
 0x674   :  { %v1609_v6 = vpop.f32.mrb[62].mxu0 }
 0x675   :  { %v1665_v30 = vpack.c.bf16 %v1609_v6, %v1603_v39  ;;  %v3340_v50 = vpop.f32.mrb[63].mxu0 }
 0x677   :  { %2204 = vmatprep.subr.bf16.mxu1 %v1665_v30 }
 0x678   :  { %v1615_v60 = vpop.f32.mrb[64].mxu0  ;;  %2205 = vmatpush3.bf16.msra.mxu1 %v1665_v30 }
 0x679   :  { %v3342_v7 = vpop.f32.mrb[65].mxu0 }
 0x67c   :  { %v1621_v4 = vpop.f32.mrb[66].mxu0 }
 0x67d   :  { %v1666_v53 = vpack.c.bf16 %v1621_v4, %v1615_v60  ;;  %v3344_v54 = vpop.f32.mrb[67].mxu0 }
 0x67f   :  { %2206 = vmatprep.subr.bf16.mxu1 %v1666_v53 }
 0x680   :  { %v1627_v1 = vpop.f32.mrb[68].mxu0  ;;  %2207 = vmatpush3.bf16.msra.mxu1 %v1666_v53 }
 0x681   :  { %v3346_v58 = vpop.f32.mrb[69].mxu0 }
 0x684   :  { %v1633_v37 = vpop.f32.mrb[70].mxu0 }
 0x685   :  { %v1667_v3 = vpack.c.bf16 %v1633_v37, %v1627_v1  ;;  %v3348_v41 = vpop.f32.mrb[71].mxu0 }
 0x687   :  { %2208 = vmatprep.subr.bf16.mxu1 %v1667_v3 }
 0x688   :  { %v1639_v22 = vpop.f32.mrb[72].mxu0  ;;  %2209 = vmatpush3.bf16.msra.mxu1 %v1667_v3 }
 0x689   :  { %v3350_v47 = vpop.f32.mrb[73].mxu0 }
 0x68c   :  { %v1645_v59 = vpop.f32.mrb[74].mxu0 }
 0x68d   :  { %v1668_v10 = vpack.c.bf16 %v1645_v59, %v1639_v22  ;;  %v3352_v49 = vpop.f32.mrb[75].mxu0 }
 0x68f   :  { %2210 = vmatprep.subr.bf16.mxu1 %v1668_v10 }
 0x690   :  { %v1651_v31 = vpop.f32.mrb[76].mxu0  ;;  %2211 = vmatpush3.bf16.msra.mxu1 %v1668_v10 }
 0x691   :  { %v3354_v16 = vpop.f32.mrb[77].mxu0 }
 0x694   :  { %v1657_v36 = vpop.f32.mrb[78].mxu0 }
 0x695   :  { %v1669_v44 = vpack.c.bf16 %v1657_v36, %v1651_v31  ;;  %v3356_v15 = vpop.f32.mrb[79].mxu0 }
 0x697   :  { %2212 = vmatprep.subr.bf16.mxu1 %v1669_v44 }
 0x698   :  { %2213 = vmatpush3.bf16.msra.mxu1 %v1669_v44 }
 0x69b   :  { %2215 = vmatmul.mubr.bf16.vlgmr.msra.gmra.mrb[48].mxu1 %v2422_v27 }
 0x69c   :  { %2218 = vmatprep.mubr.bf16.mxu1 %v2423_v43 }
 0x6a3   :  { %2219 = vmatmul.mubr.bf16.gmra.mrb[52].mxu1 %v2424_v38 }
 0x6a4   :  { %2222 = vmatprep.mubr.bf16.mxu1 %v2425_v61 }
 0x6ab   :  { %2223 = vmatmul.mubr.bf16.gmra.mrb[56].mxu1 %v2426_v25 }
 0x6ac   :  { %2226 = vmatprep.mubr.bf16.mxu1 %v2427_v34 }
 0x6b3   :  { %2227 = vmatmul.mubr.bf16.gmra.mrb[60].mxu1 %v2428_v45 }
 0x76e   :  { %v2216_v11 = vpop.f32.mrb[48].mxu1 }
 0x76f   :  { %v1769_v51 = vmul.f32 %v2216_v11, %v2893_v40  ;;  %v1704_v24 = vpop.f32.mrb[49].mxu1 }
 0x770   :  { %v1767_v33 = vmul.f32 %v1704_v24, %v2891_v35  ;;  %v2217_v0 = vpop.f32.mrb[50].mxu1 }
 0x771   :  { %v1793_v14 = vadd.f32 %v3358_v32, %v1769_v51  ;;  %v1770_v8 = vmul.f32 %v2217_v0, %v2897_v5  ;;  %v1707_v39 = vpop.f32.mrb[51].mxu1 }
 0x772   :  { %v1791_v6 = vadd.f32 %v3358_v32, %v1767_v33  ;;  %v1768_v30 = vmul.f32 %v1707_v39, %v2895_v52 }
 0x773   :  { %v1794_v60 = vadd.f32 %v3358_v32, %v1770_v8  ;;  %v1809_v4 = vadd.f32 %v1793_v14, %v3330_v56 }
 0x774   :  { %v1792_v40 = vadd.f32 %v3358_v32, %v1768_v30  ;;  %v1807_v35 = vadd.f32 %v1791_v6, %v3326_v21 }
 0x775   :  { %v3375_v53 = vsel %vm1825_vm0, %v1809_v4, -1e+30  ;;  %v1810_v5 = vadd.f32 %v1794_v60, %v3332_v55 }
 0x776   :  { %1846 = vmax.xlane.f32.xlu0 %v3375_v53  ;;  %v2220_v1 = vpop.f32.mrb[52].mxu1  ;;  %v1808_v52 = vadd.f32 %v1792_v40, %v3328_v2  ;;  %v3391_v2 = vsel %vm1825_vm0, %v1807_v35, -1e+30 }
 0x777   :  { %v1773_v37 = vmul.f32 %v2220_v1, %v2903_v20  ;;  %v1720_v3 = vpop.f32.mrb[53].mxu1  ;;  %v3402_v27 = vsel %vm1825_vm0, %v1810_v5, -1e+30 }
 0x778   :  { %v1771_v56 = vmul.f32 %v1720_v3, %v2899_v17  ;;  %v2221_v22 = vpop.f32.mrb[54].mxu1  ;;  %v3384_v21 = vsel %vm1825_vm0, %v1808_v52, -1e+30 }
 0x779   :  { %v1797_v59 = vadd.f32 %v3358_v32, %v1773_v37  ;;  %v1774_v10 = vmul.f32 %v2221_v22, %v2908_v28  ;;  %1844 = vmax.xlane.f32.xlu1 %v3384_v21  ;;  %v1723_v55 = vpop.f32.mrb[55].mxu1 }
 0x77a   :  { %v1795_v20 = vadd.f32 %v3358_v32, %v1771_v56  ;;  %v1772_v17 = vmul.f32 %v1723_v55, %v2901_v19  ;;  %1842 = vmax.xlane.f32.xlu0 %v3391_v2 }
 0x77b   :  { %v1798_v31 = vadd.f32 %v3358_v32, %v1774_v10  ;;  %v1813_v36 = vadd.f32 %v1797_v59, %v3338_v29 }
 0x77c   :  { %v1796_v44 = vadd.f32 %v3358_v32, %v1772_v17  ;;  %v1811_v28 = vadd.f32 %v1795_v20, %v3334_v63 }
 0x77d   :  { %v3406_v43 = vsel %vm1825_vm0, %v1813_v36, -1e+30  ;;  %v1814_v19 = vadd.f32 %v1798_v31, %v3340_v50 }
 0x77e   :  { %1848 = vmax.xlane.f32.xlu0 %v3402_v27  ;;  %1854 = vmax.xlane.f32.xlu1 %v3406_v43  ;;  %v2224_v38 = vpop.f32.mrb[56].mxu1  ;;  %v1812_v29 = vadd.f32 %v1796_v44, %v3336_v9  ;;  %v3418_v50 = vsel %vm1825_vm0, %v1811_v28, -1e+30 }
 0x77f   :  { %v1777_v61 = vmul.f32 %v2224_v38, %v2939_v12  ;;  %v1736_v63 = vpop.f32.mrb[57].mxu1  ;;  %v3422_v51 = vsel %vm1825_vm0, %v1814_v19, -1e+30 }
 0x780   :  { %v1775_v25 = vmul.f32 %v1736_v63, %v2919_v48  ;;  %v2225_v34 = vpop.f32.mrb[58].mxu1  ;;  %v3434_v0 = vsel %vm1825_vm0, %v1812_v29, -1e+30 }
 0x781   :  { %v1801_v45 = vadd.f32 %v3358_v32, %v1777_v61  ;;  %v1778_v23 = vmul.f32 %v2225_v34, %v2948_v18  ;;  %v1739_v11 = vpop.f32.mrb[59].mxu1 }
 0x782   :  { %v1799_v9 = vadd.f32 %v3358_v32, %v1775_v25  ;;  %v1776_v12 = vmul.f32 %v1739_v11, %v2928_v57  ;;  %1850 = vmax.xlane.f32.xlu1 %v3418_v50  ;;  %1856 = vmax.xlane.f32.xlu0 %v3422_v51 }
 0x783   :  { %v1802_v48 = vadd.f32 %v3358_v32, %v1778_v23  ;;  %v1817_v18 = vadd.f32 %v1801_v45, %v3346_v58 }
 0x784   :  { %v1800_v24 = vadd.f32 %v3358_v32, %v1776_v12  ;;  %v1815_v33 = vadd.f32 %v1799_v9, %v3342_v7 }
 0x785   :  { %v3438_v14 = vsel %vm1825_vm0, %v1817_v18, -1e+30  ;;  %v1818_v57 = vadd.f32 %v1802_v48, %v3348_v41 }
 0x786   :  { %1852 = vmax.xlane.f32.xlu0 %v3434_v0  ;;  %1862 = vmax.xlane.f32.xlu1 %v3438_v14  ;;  %v2228_v8 = vpop.f32.mrb[60].mxu1  ;;  %v1816_v58 = vadd.f32 %v1800_v24, %v3344_v54  ;;  %v1834_v41 = vsel %vm1825_vm0, %v1815_v33, -1e+30 }
 0x787   :  { %v1781_v39 = vmul.f32 %v2228_v8, %v2977_v13  ;;  %v1752_v7 = vpop.f32.mrb[61].mxu1  ;;  %v1837_v35 = vsel %vm1825_vm0, %v1818_v57, -1e+30 }
 0x788   :  { %v1779_v6 = vmul.f32 %v1752_v7, %v2961_v42  ;;  %v2229_v30 = vpop.f32.mrb[62].mxu1  ;;  %v3460_v52 = vsel %vm1825_vm0, %v1816_v58, -1e+30 }
 0x789   :  { %v1805_v60 = vadd.f32 %v3358_v32, %v1781_v39  ;;  %v1782_v4 = vmul.f32 %v2229_v30, %v2981_v46  ;;  %v1755_v40 = vpop.f32.mrb[63].mxu1 }
 0x78a   :  { %v1803_v5 = vadd.f32 %v3358_v32, %v1779_v6  ;;  %v1780_v54 = vmul.f32 %v1755_v40, %v2966_v26  ;;  %1858 = vmax.xlane.f32.xlu1 %v1834_v41  ;;  %1864 = vmax.xlane.f32.xlu0 %v1837_v35 }
 0x78b   :  { %v1806_v42 = vadd.f32 %v3358_v32, %v1782_v4  ;;  %v1821_v13 = vadd.f32 %v1805_v60, %v3354_v16 }
 0x78c   :  { %v1804_v1 = vadd.f32 %v3358_v32, %v1780_v54  ;;  %v1819_v46 = vadd.f32 %v1803_v5, %v3350_v47 }
 0x78d   :  { %v1822_v37 = vadd.f32 %v1806_v42, %v3356_v15  ;;  %v3477_v47 = vsel %vm1825_vm0, %v1821_v13, -1e+30 }
 0x78e   :  { %1860 = vmax.xlane.f32.xlu0 %v3460_v52  ;;  %v3466_v26 = vsel %vm1825_vm0, %v1819_v46, -1e+30  ;;  %v1820_v3 = vadd.f32 %v1804_v1, %v3352_v49 }
 0x78f   :  { %1866 = vmax.xlane.f32.xlu1 %v3466_v26  ;;  %v3482_v15 = vsel %vm1825_vm0, %v1822_v37, -1e+30 }
 0x790   :  { %v3472_v16 = vsel %vm1825_vm0, %v1820_v3, -1e+30 }
 0x792   :  { %1868 = vmax.xlane.f32.xlu0 %v3472_v16 }
 0x793   :  { %1870 = vmax.xlane.f32.xlu1 %v3477_v47 }
 0x796   :  { %1872 = vmax.xlane.f32.xlu0 %v3482_v15 }
 0x803   :  { %v1847_v49 = vpop.xlane.xlu0 %1846 }
 0x804   :  { %v3486_v32 = vsub.f32 %v3375_v53, %v1847_v49 }
 0x806   :  { %v1894_v56 = vmul.f32 1.442695, %v3486_v32  ;;  %v1845_v22 = vpop.xlane.xlu1 %1844 }
 0x807   :  { %v1843_v59 = vpop.xlane.xlu0 %1842  ;;  %v3494_v62 = vsub.f32 %v3384_v21, %v1845_v22 }
 0x808   :  { %2358 = vpow2.f32 %v1894_v56  ;;  %v3490_v10 = vsub.f32 %v3391_v2, %v1843_v59 }
 0x809   :  { %v1892_v2 = vmul.f32 1.442695, %v3494_v62 }
 0x80a   :  { %v1890_v55 = vmul.f32 1.442695, %v3490_v10 }
 0x80b   :  { %v1849_v20 = vpop.xlane.xlu0 %1848  ;;  %v1855_v17 = vpop.xlane.xlu1 %1854 }
 0x80c   :  { %2360 = vpow2.f32 %v1890_v55  ;;  %v3497_v31 = vsub.f32 %v3402_v27, %v1849_v20  ;;  %v3500_v53 = vsub.f32 %v3406_v43, %v1855_v17 }
 0x80e   :  { %v1896_v36 = vmul.f32 1.442695, %v3497_v31  ;;  %v1902_v44 = vmul.f32 1.442695, %v3500_v53 }
 0x80f   :  { %v1851_v28 = vpop.xlane.xlu1 %1850  ;;  %v1857_v19 = vpop.xlane.xlu0 %1856 }
 0x810   :  { %2362 = vpow2.f32 %v1896_v36  ;;  %v3506_v21 = vsub.f32 %v3418_v50, %v1851_v28  ;;  %v3509_v38 = vsub.f32 %v3422_v51, %v1857_v19 }
 0x811   :  { %2364 = vpow2.f32 %v1902_v44 }
 0x812   :  { %v2359_v27 = vpop.eup %2358  ;;  %v1898_v43 = vmul.f32 1.442695, %v3506_v21  ;;  %2366 = vpow2.f32 %v1892_v2  ;;  %v1904_v63 = vmul.f32 1.442695, %v3509_v38 }
 0x813   :  { %v1853_v29 = vpop.xlane.xlu0 %1852  ;;  %v1863_v61 = vpop.xlane.xlu1 %1862  ;;  %1926 = vadd.xlane.f32.xlu1 %v2359_v27 }
 0x814   :  { %2368 = vpow2.f32 %v1898_v43  ;;  %v3514_v25 = vsub.f32 %v3434_v0, %v1853_v29  ;;  %v3517_v34 = vsub.f32 %v3438_v14, %v1863_v61 }
 0x815   :  { %2370 = vpow2.f32 %v1904_v63 }
 0x816   :  { %v2361_v45 = vpop.eup %2360  ;;  %v1910_v23 = vmul.f32 1.442695, %v3517_v34  ;;  %v1900_v11 = vmul.f32 1.442695, %v3514_v25 }
 0x817   :  { %v1859_v50 = vpop.xlane.xlu1 %1858  ;;  %v1865_v51 = vpop.xlane.xlu0 %1864  ;;  %1922 = vadd.xlane.f32.xlu1 %v2361_v45 }
 0x818   :  { %v3521_v9 = vsub.f32 %v1834_v41, %v1859_v50  ;;  %v3523_v12 = vsub.f32 %v1837_v35, %v1865_v51  ;;  %2372 = vpow2.f32 %v1910_v23 }
 0x819   :  { %2374 = vpow2.f32 %v1900_v11 }
 0x81a   :  { %v2363_v48 = vpop.eup %2362  ;;  %v1906_v18 = vmul.f32 1.442695, %v3521_v9  ;;  %v1912_v0 = vmul.f32 1.442695, %v3523_v12 }
 0x81b   :  { %v2365_v24 = vpop.eup %2364  ;;  %v1861_v33 = vpop.xlane.xlu0 %1860  ;;  %1928 = vadd.xlane.f32.xlu0 %v2363_v48 }
 0x81c   :  { %2376 = vpow2.f32 %v1906_v18  ;;  %v3528_v14 = vsub.f32 %v3460_v52, %v1861_v33  ;;  %1934 = vadd.xlane.f32.xlu1 %v2365_v24  ;;  %v1867_v57 = vpop.xlane.xlu1 %1866  ;;  %v2367_v8 = vpop.eup %2366 }
 0x81d   :  { %v3531_v58 = vsub.f32 %v3466_v26, %v1867_v57  ;;  %2378 = vpow2.f32 %v1912_v0 }
 0x81e   :  { %v2369_v39 = vpop.eup %2368  ;;  %v1908_v30 = vmul.f32 1.442695, %v3528_v14 }
 0x81f   :  { %v1914_v7 = vmul.f32 1.442695, %v3531_v58  ;;  %v1869_v6 = vpop.xlane.xlu0 %1868  ;;  %1924 = vadd.xlane.f32.xlu0 %v2367_v8  ;;  %v2371_v41 = vpop.eup %2370 }
 0x820   :  { %1930 = vadd.xlane.f32.xlu1 %v2369_v39  ;;  %v3536_v60 = vsub.f32 %v3472_v16, %v1869_v6  ;;  %v1871_v4 = vpop.xlane.xlu1 %1870 }
 0x821   :  { %2380 = vpow2.f32 %v1914_v7  ;;  %v3539_v40 = vsub.f32 %v3477_v47, %v1871_v4 }
 0x822   :  { %v2373_v35 = vpop.eup %2372  ;;  %2382 = vpow2.f32 %v1908_v30  ;;  %v1916_v42 = vmul.f32 1.442695, %v3536_v60 }
 0x823   :  { %v1918_v5 = vmul.f32 1.442695, %v3539_v40  ;;  %1936 = vadd.xlane.f32.xlu0 %v2371_v41  ;;  %v1873_v54 = vpop.xlane.xlu0 %1872  ;;  %v2375_v1 = vpop.eup %2374 }
 0x824   :  { %1942 = vadd.xlane.f32.xlu1 %v2373_v35  ;;  %v3544_v13 = vsub.f32 %v3482_v15, %v1873_v54 }
 0x825   :  { %2384 = vpow2.f32 %v1918_v5 }
 0x826   :  { %v2377_v46 = vpop.eup %2376  ;;  %2386 = vpow2.f32 %v1916_v42  ;;  %v1920_v52 = vmul.f32 1.442695, %v3544_v13 }
 0x827   :  { %1932 = vadd.xlane.f32.xlu0 %v2375_v1  ;;  %v2379_v37 = vpop.eup %2378 }
 0x828   :  { %1938 = vadd.xlane.f32.xlu1 %v2377_v46  ;;  %2388 = vpow2.f32 %v1920_v52 }
 0x82b   :  { %v2381_v26 = vpop.eup %2380  ;;  %1944 = vadd.xlane.f32.xlu0 %v2379_v37 }
 0x82c   :  { %1946 = vadd.xlane.f32.xlu1 %v2381_v26  ;;  %v2383_v3 = vpop.eup %2382 }
 0x82f   :  { %v2385_v16 = vpop.eup %2384  ;;  %1940 = vadd.xlane.f32.xlu0 %v2383_v3 }
 0x830   :  { %1950 = vadd.xlane.f32.xlu1 %v2385_v16  ;;  %v2387_v47 = vpop.eup %2386 }
 0x832   :  { %v2389_v15 = vpop.eup %2388 }
 0x833   :  { %1948 = vadd.xlane.f32.xlu0 %v2387_v47 }
 0x837   :  { %1952 = vadd.xlane.f32.xlu0 %v2389_v15 }
 0x8a0   :  { %v1927_v49 = vpop.xlane.xlu1 %1926 }
 0x8a1   :  { %2390 = vlog2.f32 %v1927_v49 }
 0x8a4   :  { %v1923_v56 = vpop.xlane.xlu1 %1922 }
 0x8a5   :  { %2392 = vlog2.f32 %v1923_v56 }
 0x8a8   :  { %v1929_v22 = vpop.xlane.xlu0 %1928 }
 0x8a9   :  { %v1935_v59 = vpop.xlane.xlu1 %1934  ;;  %2394 = vlog2.f32 %v1929_v22 }
 0x8aa   :  { %2396 = vlog2.f32 %v1935_v59 }
 0x8ab   :  { %v2391_v55 = vpop.eup %2390 }
 0x8ac   :  { %v1959_v20 = vmul.f32 0.6931472, %v2391_v55  ;;  %v1925_v17 = vpop.xlane.xlu0 %1924 }
 0x8ad   :  { %v1931_v36 = vpop.xlane.xlu1 %1930  ;;  %2398 = vlog2.f32 %v1925_v17 }
 0x8ae   :  { %v1988_v44 = vsub.f32 %v3486_v32, %v1959_v20  ;;  %2400 = vlog2.f32 %v1931_v36 }
 0x8af   :  { %v2393_v2 = vpop.eup %2392 }
 0x8b0   :  { %2004 = vst [vmem:[#allocation16 + $0x10] sm:$0xff] %v1988_v44  ;;  %v1955_v28 = vmul.f32 0.6931472, %v2393_v2  ;;  %v1937_v19 = vpop.xlane.xlu0 %1936 }
 0x8b1   :  { %v1943_v27 = vpop.xlane.xlu1 %1942  ;;  %2402 = vlog2.f32 %v1937_v19 }
 0x8b2   :  { %v1986_v43 = vsub.f32 %v3490_v10, %v1955_v28  ;;  %2404 = vlog2.f32 %v1943_v27 }
 0x8b3   :  { %v2395_v29 = vpop.eup %2394 }
 0x8b4   :  { %v2397_v61 = vpop.eup %2396  ;;  %2002 = vst [vmem:[#allocation16] sm:$0xff] %v1986_v43  ;;  %v1961_v63 = vmul.f32 0.6931472, %v2395_v29  ;;  %v1933_v45 = vpop.xlane.xlu0 %1932 }
 0x8b5   :  { %v1967_v23 = vmul.f32 0.6931472, %v2397_v61  ;;  %v1939_v11 = vpop.xlane.xlu1 %1938  ;;  %2406 = vlog2.f32 %v1933_v45 }
 0x8b6   :  { %v1989_v32 = vsub.f32 %v3497_v31, %v1961_v63  ;;  %2408 = vlog2.f32 %v1939_v11 }
 0x8b7   :  { %v2399_v50 = vpop.eup %2398  ;;  %v1992_v51 = vsub.f32 %v3500_v53, %v1967_v23 }
 0x8b8   :  { %v2401_v48 = vpop.eup %2400  ;;  %2005 = vst [vmem:[#allocation16 + $0x18] sm:$0xff] %v1989_v32  ;;  %v1957_v18 = vmul.f32 0.6931472, %v2399_v50  ;;  %v1945_v24 = vpop.xlane.xlu0 %1944 }
 0x8b9   :  { %2008 = vst [vmem:[#allocation16 + $0x30] sm:$0xff] %v1992_v51  ;;  %v1963_v10 = vmul.f32 0.6931472, %v2401_v48  ;;  %2410 = vlog2.f32 %v1945_v24  ;;  %v1947_v33 = vpop.xlane.xlu1 %1946 }
 0x8ba   :  { %v1987_v0 = vsub.f32 %v3494_v62, %v1957_v18  ;;  %2412 = vlog2.f32 %v1947_v33 }
 0x8bb   :  { %v2403_v57 = vpop.eup %2402  ;;  %v1990_v8 = vsub.f32 %v3506_v21, %v1963_v10 }
 0x8bc   :  { %v2405_v39 = vpop.eup %2404  ;;  %2003 = vst [vmem:[#allocation16 + $0x8] sm:$0xff] %v1987_v0  ;;  %v1969_v31 = vmul.f32 0.6931472, %v2403_v57  ;;  %v1941_v7 = vpop.xlane.xlu0 %1940 }
 0x8bd   :  { %2006 = vst [vmem:[#allocation16 + $0x20] sm:$0xff] %v1990_v8  ;;  %v1975_v53 = vmul.f32 0.6931472, %v2405_v39  ;;  %2414 = vlog2.f32 %v1941_v7  ;;  %v1951_v6 = vpop.xlane.xlu1 %1950 }
 0x8be   :  { %v1993_v30 = vsub.f32 %v3509_v38, %v1969_v31  ;;  %2416 = vlog2.f32 %v1951_v6 }
 0x8bf   :  { %v2407_v4 = vpop.eup %2406  ;;  %v1996_v41 = vsub.f32 %v3517_v34, %v1975_v53 }
 0x8c0   :  { %v2409_v35 = vpop.eup %2408  ;;  %2009 = vst [vmem:[#allocation16 + $0x38] sm:$0xff] %v1993_v30  ;;  %v1965_v62 = vmul.f32 0.6931472, %v2407_v4  ;;  %v1949_v5 = vpop.xlane.xlu0 %1948 }
 0x8c1   :  { %2012 = vst [vmem:[#allocation16 + $0x50] sm:$0xff] %v1996_v41  ;;  %v1971_v21 = vmul.f32 0.6931472, %v2409_v35  ;;  %2418 = vlog2.f32 %v1949_v5 }
 0x8c2   :  { %v1991_v54 = vsub.f32 %v3514_v25, %v1965_v62 }
 0x8c3   :  { %v2411_v42 = vpop.eup %2410  ;;  %v1994_v1 = vsub.f32 %v3521_v9, %v1971_v21 }
 0x8c4   :  { %v2413_v46 = vpop.eup %2412  ;;  %2007 = vst [vmem:[#allocation16 + $0x28] sm:$0xff] %v1991_v54  ;;  %v1977_v52 = vmul.f32 0.6931472, %v2411_v42  ;;  %v1953_v38 = vpop.xlane.xlu0 %1952 }
 0x8c5   :  { %2010 = vst [vmem:[#allocation16 + $0x40] sm:$0xff] %v1994_v1  ;;  %v1979_v37 = vmul.f32 0.6931472, %v2413_v46  ;;  %2420 = vlog2.f32 %v1953_v38 }
 0x8c6   :  { %v1997_v34 = vsub.f32 %v3523_v12, %v1977_v52 }
 0x8c7   :  { %v2415_v26 = vpop.eup %2414  ;;  %v1998_v3 = vsub.f32 %v3531_v58, %v1979_v37 }
 0x8c8   :  { %v2417_v16 = vpop.eup %2416  ;;  %2013 = vst [vmem:[#allocation16 + $0x58] sm:$0xff] %v1997_v34  ;;  %v1973_v47 = vmul.f32 0.6931472, %v2415_v26 }
 0x8c9   :  { %2014 = vst [vmem:[#allocation16 + $0x60] sm:$0xff] %v1998_v3  ;;  %v1983_v25 = vmul.f32 0.6931472, %v2417_v16 }
 0x8ca   :  { %v1995_v15 = vsub.f32 %v3528_v14, %v1973_v47 }
 0x8cb   :  { %v2419_v9 = vpop.eup %2418  ;;  %v2000_v49 = vsub.f32 %v3539_v40, %v1983_v25 }
 0x8cc   :  { %2011 = vst [vmem:[#allocation16 + $0x48] sm:$0xff] %v1995_v15  ;;  %v1981_v56 = vmul.f32 0.6931472, %v2419_v9 }
 0x8cd   :  { %2016 = vst [vmem:[#allocation16 + $0x70] sm:$0xff] %v2000_v49 }
 0x8ce   :  { %v1999_v22 = vsub.f32 %v3536_v60, %v1981_v56 }
 0x8cf   :  { %v2421_v59 = vpop.eup %2420 }
 0x8d0   :  { %2015 = vst [vmem:[#allocation16 + $0x68] sm:$0xff] %v1999_v22  ;;  %v1985_v12 = vmul.f32 0.6931472, %v2421_v59 }
 0x8d2   :  { %v2001_v58 = vsub.f32 %v3544_v13, %v1985_v12 }
 0x8d4   :  { %2017 = vst [vmem:[#allocation16 + $0x78] sm:$0xff] %v2001_v58 }
 0x8d5   :  { %2616 = shalt.err (!%p2613_p12)
}
 0x8d6   :  { %s2617_s23 = scalar_lea.hbm %s3586_s8, 2048 }
 0x8d7   :  { %p2618_p13 = scmp.ne.s32.totalorder %s3586_s8, %s2617_s23  ;;  %p2621_p0 = scmp.lt.u32.totalorder %s2617_s23, %s3586_s8 }
 0x8d9   :  { %p2623_p1 = pnand %p2621_p0, %p2618_p13 }
 0x8db   :  { %2626 = shalt.err (!%p2623_p1)
}
 0x8dc   :  { %2029 = dma.vmem_to_hbm [thread:$0]  %s2024_s20, 2048, %s3586_s8, [#allocation4], %s2640_s15, %s2640_s15, %s2641_s16  }
 0x8dd   :  { %2637 = dma.done.wait [#allocation4], 2048  }
 0x8de   :  { %2638 = vsyncadd [#allocation4], 4294965248 }
 0x8df   :  { %2033 = vsyncpa [#allocation3], 1 }
 0x8e0   :  { %2034 = vsyncpa [#allocation6], 1 }
 0x8e1   :  { %2035 = vsyncpa [#allocation9], 1 }
 0x8e2   :  { %2036 = vsyncpa [#allocation12], 1 }
 0x8e3   :  { %2037 = vsyncpa [#allocation15], 1 }
 0x8e4   :  { %2038 = vsyncpa [#allocation4], 1 }

</bundles_post_ra>
